<compile_context>
chip_gen: v6e
topology: v6e:2x2x1
jax: 0.10.0
libtpu: 0.0.40
codegen_flags: <defaults>
</compile_context>

<pallas_src>
import functools

import jax
import jax.numpy as jnp
import numpy as np
from jax import lax
from jax.experimental import pallas as pl
from jax.experimental.pallas import tpu as pltpu


def _silu(v):
    # silu(v) = v*sigmoid(v) = 0.5*v*(1 + tanh(v/2)); tanh runs on the EUP.
    return 0.5 * v * (1.0 + jnp.tanh(0.5 * v))


def _sppf_kernel(x_ref, w1_ref, s1_ref, b1_ref, w2_ref, s2_ref, b2_ref,
                 row_ref, col_ref, o_ref, *, spatial_w):
    cmid = w1_ref.shape[0]
    hw = x_ref.shape[-1]

    row = row_ref[...]                    # (1, HW) int32: spatial row of lane p
    col = col_ref[...]                    # (1, HW) int32: spatial col of lane p

    # Boundary masks for the separable 5x5 pool (built once, reused by all 3
    # pools).  Each tap rolls the flattened lane axis by +/-1,+/-2 (W pass) or
    # +/-W,+/-2W (H pass).  Validity is derived from the *rolled* row/col maps,
    # so the masks stay correct whichever rotation convention pltpu.roll uses,
    # and they exclude both row-crossing and full-array wrap contributions.
    # (Requires H >= 5, asserted in the wrapper.)
    w_taps = []
    h_taps = []
    for d in (-2, -1, 1, 2):
        s = (-d) % hw
        w_taps.append((s, pltpu.roll(row, s, axis=1) == row))
    for d in (-2, -1, 1, 2):
        s = (-d * spatial_w) % hw
        src_row = pltpu.roll(row, s, axis=1)
        src_col = pltpu.roll(col, s, axis=1)
        h_taps.append((s, (src_col == col) & (jnp.abs(src_row - row) <= 2)))

    neg = jnp.float32(-jnp.inf)

    def pool5(y):
        # W pass: max over in-row neighbours at distance <= 2 (XLU rolls).
        m = y
        for s, valid in w_taps:
            m = jnp.maximum(m, jnp.where(valid, pltpu.roll(y, s, axis=1), neg))
        # H pass: max over same-column neighbours at row distance <= 2.
        r = m
        for s, valid in h_taps:
            r = jnp.maximum(r, jnp.where(valid, pltpu.roll(m, s, axis=1), neg))
        return r

    # ---- conv1 (1x1) + folded BN + SiLU (bf16 MXU operands, f32 accumulate) --
    h = jnp.dot(w1_ref[...], x_ref[...], preferred_element_type=jnp.float32)
    h = _silu(h * s1_ref[...] + b1_ref[...])            # (Cmid, HW) f32, on-chip

    # ---- cascaded 5x5 max pools (h -> y1 -> y2 -> y3), all in VMEM -----------
    branches = [h]
    y = h
    for _ in range(3):
        y = pool5(y)
        branches.append(y)

    # ---- conv2 (1x1 over the channel concat) + folded BN + SiLU --------------
    w2 = w2_ref[...]                                     # (Cout, 4*Cmid) bf16
    if 4 * cmid <= 128:
        # Tiny Cmid (demo): pack the 4 branches into one K=4*Cmid operand and
        # issue a single MXU matmul instead of 4 mostly-empty ones.
        cat = jnp.concatenate([b.astype(w2.dtype) for b in branches], axis=0)
        acc = jnp.dot(w2, cat, preferred_element_type=jnp.float32)
    else:
        # Production Cmid: never materialize the (4*Cmid, HW) concat; fold it
        # into 4 accumulated MXU matmuls.
        acc = jnp.dot(w2[:, 0:cmid], branches[0].astype(w2.dtype),
                      preferred_element_type=jnp.float32)
        for b in range(1, 4):
            acc = acc + jnp.dot(w2[:, b * cmid:(b + 1) * cmid],
                                branches[b].astype(w2.dtype),
                                preferred_element_type=jnp.float32)

    out = _silu(acc * s2_ref[...] + b2_ref[...])
    o_ref[...] = out.astype(o_ref.dtype)                 # lane-dense (Cout, HW) store


def _fold_bn(gamma, beta, mean, var, eps=1e-5):
    scale = gamma / jnp.sqrt(var + eps)
    return scale, beta - mean * scale


def sppf_forward(x_nchw, params):
    """SPPF forward pass: NCHW in -> NCHW bf16 out (PyTorch SPPFBlock semantics)."""
    N, Cin, H, W = x_nchw.shape
    conv1_w, bn1 = params["conv1_w"], params["bn1"]
    conv2_w, bn2 = params["conv2_w"], params["bn2"]
    Cmid = conv1_w.shape[0]
    Cout = conv2_w.shape[0]
    assert conv2_w.shape[1] == 4 * Cmid
    assert H >= 5          # keeps the pool wrap-around masking unambiguous
    HW = H * W

    # bf16 for the big HBM operands (a real network would already produce bf16
    # activations, so the x cast would not be a separate pass there).
    x = x_nchw.astype(jnp.bfloat16).reshape(N, Cin, HW)           # free reshape
    w1t = conv1_w.reshape(Cmid, Cin).astype(jnp.bfloat16)
    w2t = conv2_w.reshape(Cout, 4 * Cmid).astype(jnp.bfloat16)
    s1, b1 = _fold_bn(*bn1)
    s2, b2 = _fold_bn(*bn2)
    s1 = s1.reshape(Cmid, 1).astype(jnp.float32)
    b1 = b1.reshape(Cmid, 1).astype(jnp.float32)
    s2 = s2.reshape(Cout, 1).astype(jnp.float32)
    b2 = b2.reshape(Cout, 1).astype(jnp.float32)

    # Spatial row/col of every flattened lane position (tiny, grid-invariant);
    # keeps integer div/mod out of the kernel.
    pos = jnp.arange(HW, dtype=jnp.int32)
    row_ids = (pos // W).reshape(1, HW)
    col_ids = (pos % W).reshape(1, HW)

    # TODO(synk): for production feature maps, add a second grid axis over H
    # tiles with a 6-row halo (receptive field of the 3 cascaded 5x5 pools) to
    # bound per-step VMEM and restore pipelining depth on v7x.
    out = pl.pallas_call(
        functools.partial(_sppf_kernel, spatial_w=W),
        out_shape=jax.ShapeDtypeStruct((N, Cout, HW), jnp.bfloat16),
        grid=(N,),
        in_specs=[
            pl.BlockSpec((None, Cin, HW), lambda n: (n, 0, 0)),
            pl.BlockSpec((Cmid, Cin), lambda n: (0, 0)),
            pl.BlockSpec((Cmid, 1), lambda n: (0, 0)),
            pl.BlockSpec((Cmid, 1), lambda n: (0, 0)),
            pl.BlockSpec((Cout, 4 * Cmid), lambda n: (0, 0)),
            pl.BlockSpec((Cout, 1), lambda n: (0, 0)),
            pl.BlockSpec((Cout, 1), lambda n: (0, 0)),
            pl.BlockSpec((1, HW), lambda n: (0, 0)),
            pl.BlockSpec((1, HW), lambda n: (0, 0)),
        ],
        out_specs=pl.BlockSpec((None, Cout, HW), lambda n: (n, 0, 0)),
        compiler_params=pltpu.CompilerParams(
            dimension_semantics=("parallel",),        # batch across TCs (megacore)
            vmem_limit_bytes=32 * 1024 * 1024,        # explicit budget, all gens
        ),
    )(x, w1t, s1, b1, w2t, s2, b2, row_ids, col_ids)

    return out.reshape(N, Cout, H, W)                 # free reshape, no transpose


# ---------------------------------------------------------------------------
# Pure-JAX f32 reference (PyTorch SPPFBlock semantics) for validation
# ---------------------------------------------------------------------------
def sppf_ref(x_nchw, params, eps=1e-5):
    def conv_bn_silu(x, w4, bn):
        gamma, beta, mean, var = bn
        w = w4.reshape(w4.shape[0], w4.shape[1]).astype(jnp.float32)
        y = jnp.einsum("oi,nihw->nohw", w, x.astype(jnp.float32))
        scale = (gamma / jnp.sqrt(var + eps)).reshape(1, -1, 1, 1)
        shift = (beta - mean * gamma / jnp.sqrt(var + eps)).reshape(1, -1, 1, 1)
        y = y * scale + shift
        return y * jax.nn.sigmoid(y)

    def maxpool5(z):
        return lax.reduce_window(z, -jnp.inf, lax.max,
                                 window_dimensions=(1, 1, 5, 5),
                                 window_strides=(1, 1, 1, 1),
                                 padding=((0, 0), (0, 0), (2, 2), (2, 2)))

    h = conv_bn_silu(x_nchw, params["conv1_w"], params["bn1"])
    y1 = maxpool5(h)
    y2 = maxpool5(y1)
    y3 = maxpool5(y2)
    cat = jnp.concatenate([h, y1, y2, y3], axis=1)
    return conv_bn_silu(cat, params["conv2_w"], params["bn2"])


def make_params(key, in_ch, out_ch):
    """PyTorch-layout parameters for SPPFBlock(in_ch, out_ch)."""
    mid = in_ch // 2
    ks = jax.random.split(key, 10)

    def bn_params(kg, kb, km, kv, c):
        return (0.5 + jax.random.uniform(kg, (c,), jnp.float32),   # gamma
                0.1 * jax.random.normal(kb, (c,), jnp.float32),    # beta
                0.1 * jax.random.normal(km, (c,), jnp.float32),    # running mean
                0.5 + jax.random.uniform(kv, (c,), jnp.float32))   # running var

    return dict(
        conv1_w=0.2 * jax.random.normal(ks[0], (mid, in_ch, 1, 1), jnp.float32),
        bn1=bn_params(ks[1], ks[2], ks[3], ks[4], mid),
        conv2_w=0.2 * jax.random.normal(ks[5], (out_ch, 4 * mid, 1, 1), jnp.float32),
        bn2=bn_params(ks[6], ks[7], ks[8], ks[9], out_ch),
    )


if __name__ == "__main__":
    key = jax.random.PRNGKey(0)
    kx, kp = jax.random.split(key)

    N, C, H, W = 2, 8, 16, 16          # NCHW, matching the PyTorch module
    out_ch = 8
    x = jax.random.normal(kx, (N, C, H, W), jnp.float32)
    params = make_params(kp, C, out_ch)

    out = jax.block_until_ready(jax.jit(sppf_forward)(x, params))
    assert out.shape == (N, out_ch, H, W)

    # Reference is evaluated on the same bf16-rounded x / conv weights the
    # kernel consumes (bf16*bf16 products accumulate exactly in f32, so this
    # isolates structural bugs from pure dtype rounding).  Remaining diffs:
    # the bf16 cast of the conv2 operands and the bf16 output store.
    x_r = x.astype(jnp.bfloat16).astype(jnp.float32)
    params_r = dict(params)
    params_r["conv1_w"] = params["conv1_w"].astype(jnp.bfloat16).astype(jnp.float32)
    params_r["conv2_w"] = params["conv2_w"].astype(jnp.bfloat16).astype(jnp.float32)
    ref = jax.block_until_ready(sppf_ref(x_r, params_r))

    np.testing.assert_allclose(np.asarray(out.astype(jnp.float32)),
                               np.asarray(ref), atol=2e-2, rtol=2e-2)
    print("KERNEL_OK")
</pallas_src>

<mosaic_0001>
module attributes {stable_mosaic.version = 11 : i64} {
  func.func @_sppf_kernel(%arg0: i32, %arg1: memref<1x8x256xbf16, #tpu.memory_space<vmem>>, %arg2: memref<4x8xbf16, #tpu.memory_space<vmem>>, %arg3: memref<4x1xf32, #tpu.memory_space<vmem>>, %arg4: memref<4x1xf32, #tpu.memory_space<vmem>>, %arg5: memref<8x16xbf16, #tpu.memory_space<vmem>>, %arg6: memref<8x1xf32, #tpu.memory_space<vmem>>, %arg7: memref<8x1xf32, #tpu.memory_space<vmem>>, %arg8: memref<1x256xi32, #tpu.memory_space<vmem>>, %arg9: memref<1x256xi32, #tpu.memory_space<vmem>>, %arg10: memref<1x8x256xbf16, #tpu.memory_space<vmem>>) attributes {dimension_semantics = [#tpu.dimension_semantics<parallel>], iteration_bounds = array<i64: 2>, scalar_prefetch = 0 : i64, scratch_operands = 0 : i64, tpu.core_type = #tpu.core_type<tc>, window_params = [{transform_indices = @transform_0, window_bounds = array<i64: 1, 8, 256>}, {pipeline_mode = #tpu.pipeline_mode<synchronous>, transform_indices = @transform_1, window_bounds = array<i64: 4, 8>}, {pipeline_mode = #tpu.pipeline_mode<synchronous>, transform_indices = @transform_2, window_bounds = array<i64: 4, 1>}, {pipeline_mode = #tpu.pipeline_mode<synchronous>, transform_indices = @transform_3, window_bounds = array<i64: 4, 1>}, {pipeline_mode = #tpu.pipeline_mode<synchronous>, transform_indices = @transform_4, window_bounds = array<i64: 8, 16>}, {pipeline_mode = #tpu.pipeline_mode<synchronous>, transform_indices = @transform_5, window_bounds = array<i64: 8, 1>}, {pipeline_mode = #tpu.pipeline_mode<synchronous>, transform_indices = @transform_6, window_bounds = array<i64: 8, 1>}, {pipeline_mode = #tpu.pipeline_mode<synchronous>, transform_indices = @transform_7, window_bounds = array<i64: 1, 256>}, {pipeline_mode = #tpu.pipeline_mode<synchronous>, transform_indices = @transform_8, window_bounds = array<i64: 1, 256>}, {transform_indices = @transform_9, window_bounds = array<i64: 1, 8, 256>}]} {
    %c0 = arith.constant 0 : index
    %c0_0 = arith.constant 0 : index
    %0 = vector.load %arg8[%c0, %c0_0] : memref<1x256xi32, #tpu.memory_space<vmem>>, vector<1x256xi32>
    %c0_1 = arith.constant 0 : index
    %c0_2 = arith.constant 0 : index
    %1 = vector.load %arg9[%c0_1, %c0_2] : memref<1x256xi32, #tpu.memory_space<vmem>>, vector<1x256xi32>
    %c2_i32 = arith.constant 2 : i32
    %2 = tpu.dynamic_rotate %0 by %c2_i32 dim 1 : vector<1x256xi32>, i32 -> vector<1x256xi32>
    %3 = arith.cmpi eq, %2, %0 : vector<1x256xi32>
    %c1_i32 = arith.constant 1 : i32
    %4 = tpu.dynamic_rotate %0 by %c1_i32 dim 1 : vector<1x256xi32>, i32 -> vector<1x256xi32>
    %5 = arith.cmpi eq, %4, %0 : vector<1x256xi32>
    %c255_i32 = arith.constant 255 : i32
    %6 = tpu.dynamic_rotate %0 by %c255_i32 dim 1 : vector<1x256xi32>, i32 -> vector<1x256xi32>
    %7 = arith.cmpi eq, %6, %0 : vector<1x256xi32>
    %c254_i32 = arith.constant 254 : i32
    %8 = tpu.dynamic_rotate %0 by %c254_i32 dim 1 : vector<1x256xi32>, i32 -> vector<1x256xi32>
    %9 = arith.cmpi eq, %8, %0 : vector<1x256xi32>
    %c32_i32 = arith.constant 32 : i32
    %10 = tpu.dynamic_rotate %0 by %c32_i32 dim 1 : vector<1x256xi32>, i32 -> vector<1x256xi32>
    %c32_i32_3 = arith.constant 32 : i32
    %11 = tpu.dynamic_rotate %1 by %c32_i32_3 dim 1 : vector<1x256xi32>, i32 -> vector<1x256xi32>
    %12 = arith.cmpi eq, %11, %1 : vector<1x256xi32>
    %13 = arith.subi %10, %0 : vector<1x256xi32>
    %14 = math.absi %13 : vector<1x256xi32>
    %c2_i32_4 = arith.constant 2 : i32
    %15 = vector.broadcast %c2_i32_4 : i32 to vector<1x256xi32>
    %16 = arith.cmpi sle, %14, %15 : vector<1x256xi32>
    %17 = arith.andi %12, %16 : vector<1x256xi1>
    %c16_i32 = arith.constant 16 : i32
    %18 = tpu.dynamic_rotate %0 by %c16_i32 dim 1 : vector<1x256xi32>, i32 -> vector<1x256xi32>
    %c16_i32_5 = arith.constant 16 : i32
    %19 = tpu.dynamic_rotate %1 by %c16_i32_5 dim 1 : vector<1x256xi32>, i32 -> vector<1x256xi32>
    %20 = arith.cmpi eq, %19, %1 : vector<1x256xi32>
    %21 = arith.subi %18, %0 : vector<1x256xi32>
    %22 = math.absi %21 : vector<1x256xi32>
    %c2_i32_6 = arith.constant 2 : i32
    %23 = vector.broadcast %c2_i32_6 : i32 to vector<1x256xi32>
    %24 = arith.cmpi sle, %22, %23 : vector<1x256xi32>
    %25 = arith.andi %20, %24 : vector<1x256xi1>
    %c240_i32 = arith.constant 240 : i32
    %26 = tpu.dynamic_rotate %0 by %c240_i32 dim 1 : vector<1x256xi32>, i32 -> vector<1x256xi32>
    %c240_i32_7 = arith.constant 240 : i32
    %27 = tpu.dynamic_rotate %1 by %c240_i32_7 dim 1 : vector<1x256xi32>, i32 -> vector<1x256xi32>
    %28 = arith.cmpi eq, %27, %1 : vector<1x256xi32>
    %29 = arith.subi %26, %0 : vector<1x256xi32>
    %30 = math.absi %29 : vector<1x256xi32>
    %c2_i32_8 = arith.constant 2 : i32
    %31 = vector.broadcast %c2_i32_8 : i32 to vector<1x256xi32>
    %32 = arith.cmpi sle, %30, %31 : vector<1x256xi32>
    %33 = arith.andi %28, %32 : vector<1x256xi1>
    %c224_i32 = arith.constant 224 : i32
    %34 = tpu.dynamic_rotate %0 by %c224_i32 dim 1 : vector<1x256xi32>, i32 -> vector<1x256xi32>
    %c224_i32_9 = arith.constant 224 : i32
    %35 = tpu.dynamic_rotate %1 by %c224_i32_9 dim 1 : vector<1x256xi32>, i32 -> vector<1x256xi32>
    %36 = arith.cmpi eq, %35, %1 : vector<1x256xi32>
    %37 = arith.subi %34, %0 : vector<1x256xi32>
    %38 = math.absi %37 : vector<1x256xi32>
    %c2_i32_10 = arith.constant 2 : i32
    %39 = vector.broadcast %c2_i32_10 : i32 to vector<1x256xi32>
    %40 = arith.cmpi sle, %38, %39 : vector<1x256xi32>
    %41 = arith.andi %36, %40 : vector<1x256xi1>
    %c0_11 = arith.constant 0 : index
    %c0_12 = arith.constant 0 : index
    %42 = vector.load %arg2[%c0_11, %c0_12] : memref<4x8xbf16, #tpu.memory_space<vmem>>, vector<4x8xbf16>
    %c0_13 = arith.constant 0 : index
    %c0_14 = arith.constant 0 : index
    %c0_15 = arith.constant 0 : index
    %43 = vector.load %arg1[%c0_13, %c0_14, %c0_15] : memref<1x8x256xbf16, #tpu.memory_space<vmem>>, vector<1x8x256xbf16>
    %44 = vector.shape_cast %43 : vector<1x8x256xbf16> to vector<8x256xbf16>
    %cst = arith.constant dense<0.000000e+00> : vector<4x256xf32>
    %45 = tpu.matmul %42, %44, %cst {dimension_numbers = #tpu.dot_dimension_numbers<[1], [0], [0], [1], [0, 0, 1, 1], [], []>} : vector<4x8xbf16>, vector<8x256xbf16>, vector<4x256xf32> -> vector<4x256xf32>
    %c0_16 = arith.constant 0 : index
    %c0_17 = arith.constant 0 : index
    %46 = vector.load %arg3[%c0_16, %c0_17] : memref<4x1xf32, #tpu.memory_space<vmem>>, vector<4x1xf32>
    %47 = vector.broadcast %46 : vector<4x1xf32> to vector<4x256xf32>
    %48 = arith.mulf %45, %47 : vector<4x256xf32>
    %c0_18 = arith.constant 0 : index
    %c0_19 = arith.constant 0 : index
    %49 = vector.load %arg4[%c0_18, %c0_19] : memref<4x1xf32, #tpu.memory_space<vmem>>, vector<4x1xf32>
    %50 = vector.broadcast %49 : vector<4x1xf32> to vector<4x256xf32>
    %51 = arith.addf %48, %50 : vector<4x256xf32>
    %cst_20 = arith.constant 5.000000e-01 : f32
    %52 = vector.broadcast %cst_20 : f32 to vector<4x256xf32>
    %53 = arith.mulf %52, %51 : vector<4x256xf32>
    %cst_21 = arith.constant 5.000000e-01 : f32
    %54 = vector.broadcast %cst_21 : f32 to vector<4x256xf32>
    %55 = arith.mulf %54, %51 : vector<4x256xf32>
    %56 = math.tanh %55 : vector<4x256xf32>
    %cst_22 = arith.constant 1.000000e+00 : f32
    %57 = vector.broadcast %cst_22 : f32 to vector<4x256xf32>
    %58 = arith.addf %57, %56 : vector<4x256xf32>
    %59 = arith.mulf %53, %58 : vector<4x256xf32>
    %c2_i32_23 = arith.constant 2 : i32
    %60 = tpu.dynamic_rotate %59 by %c2_i32_23 dim 1 : vector<4x256xf32>, i32 -> vector<4x256xf32>
    %cst_24 = arith.constant 0xFF800000 : f32
    %61 = vector.shape_cast %3 : vector<1x256xi1> to vector<1x256xi1>
    %62 = vector.broadcast %61 : vector<1x256xi1> to vector<4x256xi1>
    %63 = vector.broadcast %cst_24 : f32 to vector<4x256xf32>
    %64 = arith.select %62, %60, %63 : vector<4x256xi1>, vector<4x256xf32>
    %65 = arith.maximumf %59, %64 : vector<4x256xf32>
    %c1_i32_25 = arith.constant 1 : i32
    %66 = tpu.dynamic_rotate %59 by %c1_i32_25 dim 1 : vector<4x256xf32>, i32 -> vector<4x256xf32>
    %cst_26 = arith.constant 0xFF800000 : f32
    %67 = vector.shape_cast %5 : vector<1x256xi1> to vector<1x256xi1>
    %68 = vector.broadcast %67 : vector<1x256xi1> to vector<4x256xi1>
    %69 = vector.broadcast %cst_26 : f32 to vector<4x256xf32>
    %70 = arith.select %68, %66, %69 : vector<4x256xi1>, vector<4x256xf32>
    %71 = arith.maximumf %65, %70 : vector<4x256xf32>
    %c255_i32_27 = arith.constant 255 : i32
    %72 = tpu.dynamic_rotate %59 by %c255_i32_27 dim 1 : vector<4x256xf32>, i32 -> vector<4x256xf32>
    %cst_28 = arith.constant 0xFF800000 : f32
    %73 = vector.shape_cast %7 : vector<1x256xi1> to vector<1x256xi1>
    %74 = vector.broadcast %73 : vector<1x256xi1> to vector<4x256xi1>
    %75 = vector.broadcast %cst_28 : f32 to vector<4x256xf32>
    %76 = arith.select %74, %72, %75 : vector<4x256xi1>, vector<4x256xf32>
    %77 = arith.maximumf %71, %76 : vector<4x256xf32>
    %c254_i32_29 = arith.constant 254 : i32
    %78 = tpu.dynamic_rotate %59 by %c254_i32_29 dim 1 : vector<4x256xf32>, i32 -> vector<4x256xf32>
    %cst_30 = arith.constant 0xFF800000 : f32
    %79 = vector.shape_cast %9 : vector<1x256xi1> to vector<1x256xi1>
    %80 = vector.broadcast %79 : vector<1x256xi1> to vector<4x256xi1>
    %81 = vector.broadcast %cst_30 : f32 to vector<4x256xf32>
    %82 = arith.select %80, %78, %81 : vector<4x256xi1>, vector<4x256xf32>
    %83 = arith.maximumf %77, %82 : vector<4x256xf32>
    %c32_i32_31 = arith.constant 32 : i32
    %84 = tpu.dynamic_rotate %83 by %c32_i32_31 dim 1 : vector<4x256xf32>, i32 -> vector<4x256xf32>
    %cst_32 = arith.constant 0xFF800000 : f32
    %85 = vector.shape_cast %17 : vector<1x256xi1> to vector<1x256xi1>
    %86 = vector.broadcast %85 : vector<1x256xi1> to vector<4x256xi1>
    %87 = vector.broadcast %cst_32 : f32 to vector<4x256xf32>
    %88 = arith.select %86, %84, %87 : vector<4x256xi1>, vector<4x256xf32>
    %89 = arith.maximumf %83, %88 : vector<4x256xf32>
    %c16_i32_33 = arith.constant 16 : i32
    %90 = tpu.dynamic_rotate %83 by %c16_i32_33 dim 1 : vector<4x256xf32>, i32 -> vector<4x256xf32>
    %cst_34 = arith.constant 0xFF800000 : f32
    %91 = vector.shape_cast %25 : vector<1x256xi1> to vector<1x256xi1>
    %92 = vector.broadcast %91 : vector<1x256xi1> to vector<4x256xi1>
    %93 = vector.broadcast %cst_34 : f32 to vector<4x256xf32>
    %94 = arith.select %92, %90, %93 : vector<4x256xi1>, vector<4x256xf32>
    %95 = arith.maximumf %89, %94 : vector<4x256xf32>
    %c240_i32_35 = arith.constant 240 : i32
    %96 = tpu.dynamic_rotate %83 by %c240_i32_35 dim 1 : vector<4x256xf32>, i32 -> vector<4x256xf32>
    %cst_36 = arith.constant 0xFF800000 : f32
    %97 = vector.shape_cast %33 : vector<1x256xi1> to vector<1x256xi1>
    %98 = vector.broadcast %97 : vector<1x256xi1> to vector<4x256xi1>
    %99 = vector.broadcast %cst_36 : f32 to vector<4x256xf32>
    %100 = arith.select %98, %96, %99 : vector<4x256xi1>, vector<4x256xf32>
    %101 = arith.maximumf %95, %100 : vector<4x256xf32>
    %c224_i32_37 = arith.constant 224 : i32
    %102 = tpu.dynamic_rotate %83 by %c224_i32_37 dim 1 : vector<4x256xf32>, i32 -> vector<4x256xf32>
    %cst_38 = arith.constant 0xFF800000 : f32
    %103 = vector.shape_cast %41 : vector<1x256xi1> to vector<1x256xi1>
    %104 = vector.broadcast %103 : vector<1x256xi1> to vector<4x256xi1>
    %105 = vector.broadcast %cst_38 : f32 to vector<4x256xf32>
    %106 = arith.select %104, %102, %105 : vector<4x256xi1>, vector<4x256xf32>
    %107 = arith.maximumf %101, %106 : vector<4x256xf32>
    %c2_i32_39 = arith.constant 2 : i32
    %108 = tpu.dynamic_rotate %107 by %c2_i32_39 dim 1 : vector<4x256xf32>, i32 -> vector<4x256xf32>
    %cst_40 = arith.constant 0xFF800000 : f32
    %109 = vector.shape_cast %3 : vector<1x256xi1> to vector<1x256xi1>
    %110 = vector.broadcast %109 : vector<1x256xi1> to vector<4x256xi1>
    %111 = vector.broadcast %cst_40 : f32 to vector<4x256xf32>
    %112 = arith.select %110, %108, %111 : vector<4x256xi1>, vector<4x256xf32>
    %113 = arith.maximumf %107, %112 : vector<4x256xf32>
    %c1_i32_41 = arith.constant 1 : i32
    %114 = tpu.dynamic_rotate %107 by %c1_i32_41 dim 1 : vector<4x256xf32>, i32 -> vector<4x256xf32>
    %cst_42 = arith.constant 0xFF800000 : f32
    %115 = vector.shape_cast %5 : vector<1x256xi1> to vector<1x256xi1>
    %116 = vector.broadcast %115 : vector<1x256xi1> to vector<4x256xi1>
    %117 = vector.broadcast %cst_42 : f32 to vector<4x256xf32>
    %118 = arith.select %116, %114, %117 : vector<4x256xi1>, vector<4x256xf32>
    %119 = arith.maximumf %113, %118 : vector<4x256xf32>
    %c255_i32_43 = arith.constant 255 : i32
    %120 = tpu.dynamic_rotate %107 by %c255_i32_43 dim 1 : vector<4x256xf32>, i32 -> vector<4x256xf32>
    %cst_44 = arith.constant 0xFF800000 : f32
    %121 = vector.shape_cast %7 : vector<1x256xi1> to vector<1x256xi1>
    %122 = vector.broadcast %121 : vector<1x256xi1> to vector<4x256xi1>
    %123 = vector.broadcast %cst_44 : f32 to vector<4x256xf32>
    %124 = arith.select %122, %120, %123 : vector<4x256xi1>, vector<4x256xf32>
    %125 = arith.maximumf %119, %124 : vector<4x256xf32>
    %c254_i32_45 = arith.constant 254 : i32
    %126 = tpu.dynamic_rotate %107 by %c254_i32_45 dim 1 : vector<4x256xf32>, i32 -> vector<4x256xf32>
    %cst_46 = arith.constant 0xFF800000 : f32
    %127 = vector.shape_cast %9 : vector<1x256xi1> to vector<1x256xi1>
    %128 = vector.broadcast %127 : vector<1x256xi1> to vector<4x256xi1>
    %129 = vector.broadcast %cst_46 : f32 to vector<4x256xf32>
    %130 = arith.select %128, %126, %129 : vector<4x256xi1>, vector<4x256xf32>
    %131 = arith.maximumf %125, %130 : vector<4x256xf32>
    %c32_i32_47 = arith.constant 32 : i32
    %132 = tpu.dynamic_rotate %131 by %c32_i32_47 dim 1 : vector<4x256xf32>, i32 -> vector<4x256xf32>
    %cst_48 = arith.constant 0xFF800000 : f32
    %133 = vector.shape_cast %17 : vector<1x256xi1> to vector<1x256xi1>
    %134 = vector.broadcast %133 : vector<1x256xi1> to vector<4x256xi1>
    %135 = vector.broadcast %cst_48 : f32 to vector<4x256xf32>
    %136 = arith.select %134, %132, %135 : vector<4x256xi1>, vector<4x256xf32>
    %137 = arith.maximumf %131, %136 : vector<4x256xf32>
    %c16_i32_49 = arith.constant 16 : i32
    %138 = tpu.dynamic_rotate %131 by %c16_i32_49 dim 1 : vector<4x256xf32>, i32 -> vector<4x256xf32>
    %cst_50 = arith.constant 0xFF800000 : f32
    %139 = vector.shape_cast %25 : vector<1x256xi1> to vector<1x256xi1>
    %140 = vector.broadcast %139 : vector<1x256xi1> to vector<4x256xi1>
    %141 = vector.broadcast %cst_50 : f32 to vector<4x256xf32>
    %142 = arith.select %140, %138, %141 : vector<4x256xi1>, vector<4x256xf32>
    %143 = arith.maximumf %137, %142 : vector<4x256xf32>
    %c240_i32_51 = arith.constant 240 : i32
    %144 = tpu.dynamic_rotate %131 by %c240_i32_51 dim 1 : vector<4x256xf32>, i32 -> vector<4x256xf32>
    %cst_52 = arith.constant 0xFF800000 : f32
    %145 = vector.shape_cast %33 : vector<1x256xi1> to vector<1x256xi1>
    %146 = vector.broadcast %145 : vector<1x256xi1> to vector<4x256xi1>
    %147 = vector.broadcast %cst_52 : f32 to vector<4x256xf32>
    %148 = arith.select %146, %144, %147 : vector<4x256xi1>, vector<4x256xf32>
    %149 = arith.maximumf %143, %148 : vector<4x256xf32>
    %c224_i32_53 = arith.constant 224 : i32
    %150 = tpu.dynamic_rotate %131 by %c224_i32_53 dim 1 : vector<4x256xf32>, i32 -> vector<4x256xf32>
    %cst_54 = arith.constant 0xFF800000 : f32
    %151 = vector.shape_cast %41 : vector<1x256xi1> to vector<1x256xi1>
    %152 = vector.broadcast %151 : vector<1x256xi1> to vector<4x256xi1>
    %153 = vector.broadcast %cst_54 : f32 to vector<4x256xf32>
    %154 = arith.select %152, %150, %153 : vector<4x256xi1>, vector<4x256xf32>
    %155 = arith.maximumf %149, %154 : vector<4x256xf32>
    %c2_i32_55 = arith.constant 2 : i32
    %156 = tpu.dynamic_rotate %155 by %c2_i32_55 dim 1 : vector<4x256xf32>, i32 -> vector<4x256xf32>
    %cst_56 = arith.constant 0xFF800000 : f32
    %157 = vector.shape_cast %3 : vector<1x256xi1> to vector<1x256xi1>
    %158 = vector.broadcast %157 : vector<1x256xi1> to vector<4x256xi1>
    %159 = vector.broadcast %cst_56 : f32 to vector<4x256xf32>
    %160 = arith.select %158, %156, %159 : vector<4x256xi1>, vector<4x256xf32>
    %161 = arith.maximumf %155, %160 : vector<4x256xf32>
    %c1_i32_57 = arith.constant 1 : i32
    %162 = tpu.dynamic_rotate %155 by %c1_i32_57 dim 1 : vector<4x256xf32>, i32 -> vector<4x256xf32>
    %cst_58 = arith.constant 0xFF800000 : f32
    %163 = vector.shape_cast %5 : vector<1x256xi1> to vector<1x256xi1>
    %164 = vector.broadcast %163 : vector<1x256xi1> to vector<4x256xi1>
    %165 = vector.broadcast %cst_58 : f32 to vector<4x256xf32>
    %166 = arith.select %164, %162, %165 : vector<4x256xi1>, vector<4x256xf32>
    %167 = arith.maximumf %161, %166 : vector<4x256xf32>
    %c255_i32_59 = arith.constant 255 : i32
    %168 = tpu.dynamic_rotate %155 by %c255_i32_59 dim 1 : vector<4x256xf32>, i32 -> vector<4x256xf32>
    %cst_60 = arith.constant 0xFF800000 : f32
    %169 = vector.shape_cast %7 : vector<1x256xi1> to vector<1x256xi1>
    %170 = vector.broadcast %169 : vector<1x256xi1> to vector<4x256xi1>
    %171 = vector.broadcast %cst_60 : f32 to vector<4x256xf32>
    %172 = arith.select %170, %168, %171 : vector<4x256xi1>, vector<4x256xf32>
    %173 = arith.maximumf %167, %172 : vector<4x256xf32>
    %c254_i32_61 = arith.constant 254 : i32
    %174 = tpu.dynamic_rotate %155 by %c254_i32_61 dim 1 : vector<4x256xf32>, i32 -> vector<4x256xf32>
    %cst_62 = arith.constant 0xFF800000 : f32
    %175 = vector.shape_cast %9 : vector<1x256xi1> to vector<1x256xi1>
    %176 = vector.broadcast %175 : vector<1x256xi1> to vector<4x256xi1>
    %177 = vector.broadcast %cst_62 : f32 to vector<4x256xf32>
    %178 = arith.select %176, %174, %177 : vector<4x256xi1>, vector<4x256xf32>
    %179 = arith.maximumf %173, %178 : vector<4x256xf32>
    %c32_i32_63 = arith.constant 32 : i32
    %180 = tpu.dynamic_rotate %179 by %c32_i32_63 dim 1 : vector<4x256xf32>, i32 -> vector<4x256xf32>
    %cst_64 = arith.constant 0xFF800000 : f32
    %181 = vector.shape_cast %17 : vector<1x256xi1> to vector<1x256xi1>
    %182 = vector.broadcast %181 : vector<1x256xi1> to vector<4x256xi1>
    %183 = vector.broadcast %cst_64 : f32 to vector<4x256xf32>
    %184 = arith.select %182, %180, %183 : vector<4x256xi1>, vector<4x256xf32>
    %185 = arith.maximumf %179, %184 : vector<4x256xf32>
    %c16_i32_65 = arith.constant 16 : i32
    %186 = tpu.dynamic_rotate %179 by %c16_i32_65 dim 1 : vector<4x256xf32>, i32 -> vector<4x256xf32>
    %cst_66 = arith.constant 0xFF800000 : f32
    %187 = vector.shape_cast %25 : vector<1x256xi1> to vector<1x256xi1>
    %188 = vector.broadcast %187 : vector<1x256xi1> to vector<4x256xi1>
    %189 = vector.broadcast %cst_66 : f32 to vector<4x256xf32>
    %190 = arith.select %188, %186, %189 : vector<4x256xi1>, vector<4x256xf32>
    %191 = arith.maximumf %185, %190 : vector<4x256xf32>
    %c240_i32_67 = arith.constant 240 : i32
    %192 = tpu.dynamic_rotate %179 by %c240_i32_67 dim 1 : vector<4x256xf32>, i32 -> vector<4x256xf32>
    %cst_68 = arith.constant 0xFF800000 : f32
    %193 = vector.shape_cast %33 : vector<1x256xi1> to vector<1x256xi1>
    %194 = vector.broadcast %193 : vector<1x256xi1> to vector<4x256xi1>
    %195 = vector.broadcast %cst_68 : f32 to vector<4x256xf32>
    %196 = arith.select %194, %192, %195 : vector<4x256xi1>, vector<4x256xf32>
    %197 = arith.maximumf %191, %196 : vector<4x256xf32>
    %c224_i32_69 = arith.constant 224 : i32
    %198 = tpu.dynamic_rotate %179 by %c224_i32_69 dim 1 : vector<4x256xf32>, i32 -> vector<4x256xf32>
    %cst_70 = arith.constant 0xFF800000 : f32
    %199 = vector.shape_cast %41 : vector<1x256xi1> to vector<1x256xi1>
    %200 = vector.broadcast %199 : vector<1x256xi1> to vector<4x256xi1>
    %201 = vector.broadcast %cst_70 : f32 to vector<4x256xf32>
    %202 = arith.select %200, %198, %201 : vector<4x256xi1>, vector<4x256xf32>
    %203 = arith.maximumf %197, %202 : vector<4x256xf32>
    %c0_71 = arith.constant 0 : index
    %c0_72 = arith.constant 0 : index
    %204 = vector.load %arg5[%c0_71, %c0_72] : memref<8x16xbf16, #tpu.memory_space<vmem>>, vector<8x16xbf16>
    %205 = arith.truncf %59 : vector<4x256xf32> to vector<4x256xbf16>
    %206 = arith.truncf %107 : vector<4x256xf32> to vector<4x256xbf16>
    %207 = arith.truncf %155 : vector<4x256xf32> to vector<4x256xbf16>
    %208 = arith.truncf %203 : vector<4x256xf32> to vector<4x256xbf16>
    %209 = tpu.concatenate %205, %206, %207, %208 in 0 : vector<4x256xbf16>, vector<4x256xbf16>, vector<4x256xbf16>, vector<4x256xbf16> -> vector<16x256xbf16>
    %cst_73 = arith.constant dense<0.000000e+00> : vector<8x256xf32>
    %210 = tpu.matmul %204, %209, %cst_73 {dimension_numbers = #tpu.dot_dimension_numbers<[1], [0], [0], [1], [0, 0, 1, 1], [], []>} : vector<8x16xbf16>, vector<16x256xbf16>, vector<8x256xf32> -> vector<8x256xf32>
    %c0_74 = arith.constant 0 : index
    %c0_75 = arith.constant 0 : index
    %211 = vector.load %arg6[%c0_74, %c0_75] : memref<8x1xf32, #tpu.memory_space<vmem>>, vector<8x1xf32>
    %212 = vector.broadcast %211 : vector<8x1xf32> to vector<8x256xf32>
    %213 = arith.mulf %210, %212 : vector<8x256xf32>
    %c0_76 = arith.constant 0 : index
    %c0_77 = arith.constant 0 : index
    %214 = vector.load %arg7[%c0_76, %c0_77] : memref<8x1xf32, #tpu.memory_space<vmem>>, vector<8x1xf32>
    %215 = vector.broadcast %214 : vector<8x1xf32> to vector<8x256xf32>
    %216 = arith.addf %213, %215 : vector<8x256xf32>
    %cst_78 = arith.constant 5.000000e-01 : f32
    %217 = vector.broadcast %cst_78 : f32 to vector<8x256xf32>
    %218 = arith.mulf %217, %216 : vector<8x256xf32>
    %cst_79 = arith.constant 5.000000e-01 : f32
    %219 = vector.broadcast %cst_79 : f32 to vector<8x256xf32>
    %220 = arith.mulf %219, %216 : vector<8x256xf32>
    %221 = math.tanh %220 : vector<8x256xf32>
    %cst_80 = arith.constant 1.000000e+00 : f32
    %222 = vector.broadcast %cst_80 : f32 to vector<8x256xf32>
    %223 = arith.addf %222, %221 : vector<8x256xf32>
    %224 = arith.mulf %218, %223 : vector<8x256xf32>
    %225 = arith.truncf %224 : vector<8x256xf32> to vector<8x256xbf16>
    %c0_81 = arith.constant 0 : index
    %c0_82 = arith.constant 0 : index
    %c0_83 = arith.constant 0 : index
    %226 = vector.load %arg10[%c0_81, %c0_82, %c0_83] : memref<1x8x256xbf16, #tpu.memory_space<vmem>>, vector<1x8x256xbf16>
    %227 = vector.shape_cast %226 : vector<1x8x256xbf16> to vector<8x256xbf16>
    %228 = vector.shape_cast %225 : vector<8x256xbf16> to vector<1x8x256xbf16>
    tpu.vector_store %arg10[%c0_81, %c0_82, %c0_83], %228 {strides = array<i32>} : memref<1x8x256xbf16, #tpu.memory_space<vmem>>, vector<1x8x256xbf16>,
    return
  }
  func.func @transform_0(%arg0: i32) -> (i32, i32, i32) {
    %c0_i32 = arith.constant 0 : i32
    %c0_i32_0 = arith.constant 0 : i32
    %c0_i32_1 = arith.constant 0 : i32
    return %arg0, %c0_i32, %c0_i32_0 : i32, i32, i32
  }
  func.func @transform_1(%arg0: i32) -> (i32, i32) {
    %c0_i32 = arith.constant 0 : i32
    %c0_i32_0 = arith.constant 0 : i32
    %c0_i32_1 = arith.constant 0 : i32
    return %c0_i32, %c0_i32_0 : i32, i32
  }
  func.func @transform_2(%arg0: i32) -> (i32, i32) {
    %c0_i32 = arith.constant 0 : i32
    %c0_i32_0 = arith.constant 0 : i32
    %c0_i32_1 = arith.constant 0 : i32
    return %c0_i32, %c0_i32_0 : i32, i32
  }
  func.func @transform_3(%arg0: i32) -> (i32, i32) {
    %c0_i32 = arith.constant 0 : i32
    %c0_i32_0 = arith.constant 0 : i32
    %c0_i32_1 = arith.constant 0 : i32
    return %c0_i32, %c0_i32_0 : i32, i32
  }
  func.func @transform_4(%arg0: i32) -> (i32, i32) {
    %c0_i32 = arith.constant 0 : i32
    %c0_i32_0 = arith.constant 0 : i32
    %c0_i32_1 = arith.constant 0 : i32
    return %c0_i32, %c0_i32_0 : i32, i32
  }
  func.func @transform_5(%arg0: i32) -> (i32, i32) {
    %c0_i32 = arith.constant 0 : i32
    %c0_i32_0 = arith.constant 0 : i32
    %c0_i32_1 = arith.constant 0 : i32
    return %c0_i32, %c0_i32_0 : i32, i32
  }
  func.func @transform_6(%arg0: i32) -> (i32, i32) {
    %c0_i32 = arith.constant 0 : i32
    %c0_i32_0 = arith.constant 0 : i32
    %c0_i32_1 = arith.constant 0 : i32
    return %c0_i32, %c0_i32_0 : i32, i32
  }
  func.func @transform_7(%arg0: i32) -> (i32, i32) {
    %c0_i32 = arith.constant 0 : i32
    %c0_i32_0 = arith.constant 0 : i32
    %c0_i32_1 = arith.constant 0 : i32
    return %c0_i32, %c0_i32_0 : i32, i32
  }
  func.func @transform_8(%arg0: i32) -> (i32, i32) {
    %c0_i32 = arith.constant 0 : i32
    %c0_i32_0 = arith.constant 0 : i32
    %c0_i32_1 = arith.constant 0 : i32
    return %c0_i32, %c0_i32_0 : i32, i32
  }
  func.func @transform_9(%arg0: i32) -> (i32, i32, i32) {
    %c0_i32 = arith.constant 0 : i32
    %c0_i32_0 = arith.constant 0 : i32
    %c0_i32_1 = arith.constant 0 : i32
    return %arg0, %c0_i32, %c0_i32_0 : i32, i32, i32
  }
}

</mosaic_0001>

<bundles_post_ra>
// kernel: sppf_forward.1
= control target key start
LH: loop header
LB: loop body
LE: loop exit
PB: predicated region body
PF: predicated region fallthrough
CT: control target
= control target key end

     0   :  { %s1333_s30 = smov 0   ;;  %s1889_s0 = inlined_call_operand.vmem [shape: bf16[2,8,256], index: 0, kind: input, shape index: {}]   ;;  %s1890_s1 = inlined_call_operand.vmem [shape: bf16[4,8], index: 1, kind: input, shape index: {}]   ;;  %s1891_s2 = inlined_call_operand.vmem [shape: f32[4,1], index: 2, kind: input, shape index: {}]   ;;  %s1892_s3 = inlined_call_operand.vmem [shape: f32[4,1], index: 3, kind: input, shape index: {}]   ;;  %s1893_s4 = inlined_call_operand.vmem [shape: bf16[8,16], index: 4, kind: input, shape index: {}]   ;;  %s1894_s5 = inlined_call_operand.vmem [shape: f32[8,1], index: 5, kind: input, shape index: {}]   ;;  %s1895_s6 = inlined_call_operand.vmem [shape: f32[8,1], index: 6, kind: input, shape index: {}]   ;;  %s1896_s7 = inlined_call_operand.vmem [shape: s32[1,256], index: 7, kind: input, shape index: {}]   ;;  %s1897_s8 = inlined_call_operand.vmem [shape: s32[1,256], index: 8, kind: input, shape index: {}]   ;;  %s1898_s9 = inlined_call_operand.vmem [shape: bf16[2,8,256], index: 9, kind: output, shape index: {}]  }
   0x1 LB: > { %s1089_s10 = sadd.s32 4294967295, %s1272_s30   ;;  %p1093_p0 = scmp.ge.s32.totalorder %s1272_s30, 1  ;;  %s1272_s30 = sphi %s1333_s30, %s19_s30  }
   0x2   : > { %p287_p1 = scmp.lt.s32.totalorder %s1272_s30, 3 }
   0x4   : > { %p288_p2 = pnand %p1093_p0, %p287_p1 }
   0x5   : > { %p323_p3 = scmp.lt.s32.totalorder (!%p288_p2), %s1089_s10, 1  ;;  %s1275_s23 = smov (!%p288_p2), 2  }
   0x6   : > { %291 = sbr.rel (%p288_p2) target bundleno = 1256 (0x4e8), region = 56  ;;  %s1276_s24 = smov (!%p288_p2), 1  }
   0x7   : > { %s1277_s25 = smov (!%p288_p2), 127   ;;  %s1278_s26 = smov (!%p288_p2), 126  }
   0x8   : > { %s1279_s27 = smov (!%p288_p2), 32   ;;  %s1280_s28 = smov (!%p288_p2), 16  }
   0x9   : > { %s1281_s12 = smov (!%p288_p2), 112   ;;  %s1282_s13 = smov (!%p288_p2), 96  }
   0xb   : > { %v1274_v0 = vmov 0   ;;  %v557_v1 = vld [vmem:[%s1891_s2] sm:$0xf]  ;;  %s2015_s10 = smov (!%p323_p3, %s1089_s10), 1  ;;  %vm1899_vm0 = vcmask 1043456   ;;  %vm505_vm1 = vcmask 64512   ;;  %v336_v8 = vlaneseq }
   0xc   : > { %548 = vmatprep.mubr.bf16.mxu0 %v1274_v0  ;;  %1134 = vset.pattern.permute.xlu0 %v1274_v0  ;;  %v565_v2 = vld [vmem:[%s1892_s3] sm:$0xf]  ;;  %s1114_s15 = sshll.u32 %s2015_s10, 3 }
   0xd   : > { %560 = vperm.xlu0 %1134, %v557_v1   ;;  %992 = vmatprep.mubr.bf16.mxu1 %v1274_v0  ;;  %s327_s18 = scalar_lea.vmem %s1889_s0, %s1114_s15  ;;  %v498_v7 = vld [vmem:[%s1890_s1] sm:$0x3]  ;;  %v337_v9 = vshrl.u32 %v336_v8, 7  ;;  %v1442_v41 = vand.u32 127, %v336_v8  ;;  %v1925_v1 = vmov 0 }
   0xe   : > { %1255 = vset.pattern.permute.xlu1 %v1274_v0  ;;  %v499_v3 = vld [vmem:[%s327_s18] sm:$0xff] }
   0xf   : > { %v1107_v4 = vcombine.high %v499_v3, %v499_v3  ;;  %v1106_v5 = vcombine.low %v499_v3, %v499_v3  ;;  %v1365_v10 = vsub.s32 0, %v337_v9  ;;  %v334_v11 = vld [vmem:[%s1896_s7] sm:$0x3]  ;;  %v342_v13 = vsub.s32 1, %v337_v9 }
  0x10   : > { %v335_v34 = vld [vmem:[%s1897_s8] sm:$0x3]  ;;  %vm1902_vm2 = vcmp.lt.s32.totalorder %v1442_v41, 2  ;;  %vm1903_vm3 = vcmp.lt.s32.totalorder %v1442_v41, 1  ;;  %vm1900_vm6 = vcmp.lt.s32.totalorder %v1442_v41, 127  ;;  %vm1901_vm7 = vcmp.lt.s32.totalorder %v1442_v41, 126 }
  0x11   : > { %568 = vperm.xlu0 %1134, %v565_v2   ;;  %1108 = vmatprep.subr.msk.bf16.mxu0 %vm1899_vm0, %v1107_v4  ;;  %v511_v6 = vsel %vm1899_vm0, %v1106_v5, 0  ;;  %v1371_v12 = vrot.slane %v334_v11, %v1365_v10  ;;  %v1375_v14 = vrot.slane %v334_v11, %v342_v13  ;;  %v1416_v35 = vrot.slane %v335_v34, %v342_v13 }
  0x12   : > { %531 = vmatpush1.bf16.msra.mxu0 %v511_v6  ;;  %v1419_v36 = vrot.slane %v335_v34, %v1365_v10  ;;  %v1927_v2 = vmov 0  ;;  %v1929_v13 = vmov 0  ;;  %vm1905_vm0 = vcmp.lt.s32.totalorder %v1442_v41, 96 }
  0x13   : > { %344 = vrot.lane.b32.xlu1 %v1371_v12, %s1275_s23 }
  0x15   : > { %1109 = vmatmul.mubr.msk.bf16.vlgmr.msra.gmra.mxu0 %vm505_vm1, %v498_v7  ;;  %355 = vrot.lane.b32.xlu0 %v1371_v12, %s1276_s24 }
  0x17   : > { %346 = vrot.lane.b32.xlu1 %v1375_v14, %s1275_s23 }
  0x19   : > { %364 = vrot.lane.b32.xlu0 %v1371_v12, %s1277_s25 }
  0x1b   : > { %357 = vrot.lane.b32.xlu1 %v1375_v14, %s1276_s24 }
  0x1d   : > { %375 = vrot.lane.b32.xlu0 %v1375_v14, %s1278_s26 }
  0x1f   : > { %366 = vrot.lane.b32.xlu1 %v1375_v14, %s1277_s25 }
  0x23   : > { %373 = vrot.lane.b32.xlu1 %v1371_v12, %s1278_s26 }
  0x85   : > { %v345_v37 = vpop.permute.xlu1 %344 }
  0x88   : > { %v561_v15 = vpop.permute.xlu0 %560 }
  0x89   : > { %v347_v38 = vpop.permute.xlu1 %346 }
  0x8a   : > { %v351_v44 = vsel %vm1902_vm2, %v345_v37, %v347_v38  ;;  %v352_v45 = vsel %vm1902_vm2, %v347_v38, %v345_v37 }
  0x8b   : > { %vm353_vm4 = vcmp.eq.s32.totalorder %v352_v45, %v1371_v12  ;;  %vm354_vm5 = vcmp.eq.s32.totalorder %v351_v44, %v1375_v14 }
  0x8c   : > { %v569_v18 = vpop.permute.xlu0 %568  ;;  %v587_v50 = vsel %vm353_vm4, 1, %v1274_v0  ;;  %v588_v51 = vsel %vm354_vm5, 1, %v1274_v0 }
  0x8d   : > { %v358_v40 = vpop.permute.xlu1 %357  ;;  %v592_v58 = vrot.slane %v587_v50, %v1365_v10  ;;  %v596_v59 = vrot.slane %v588_v51, %v1365_v10  ;;  %v1937_v51 = vmov 0 }
  0x8f   : > { %vm1482_vm14 = vcmp.eq.s32.totalorder %v592_v58, 1  ;;  %vm1486_vm15 = vcmp.eq.s32.totalorder %v596_v59, 1 }
  0x90   : > { %v356_v39 = vpop.permute.xlu0 %355  ;;  %v1926_v1 = vsel %vm1482_vm14, 4294967295, %v1925_v1  ;;  %v1928_v2 = vsel %vm1486_vm15, 4294967295, %v1927_v2 }
  0x91   : > { %v367_v43 = vpop.permute.xlu1 %366  ;;  %v360_v46 = vsel %vm1903_vm3, %v356_v39, %v358_v40  ;;  %v361_v47 = vsel %vm1903_vm3, %v358_v40, %v356_v39  ;;  %v1933_v40 = vmov 0 }
  0x92   : > { %vm362_vm8 = vcmp.eq.s32.totalorder %v361_v47, %v1371_v12  ;;  %vm363_vm9 = vcmp.eq.s32.totalorder %v360_v46, %v1375_v14 }
  0x93   : > { %v609_v56 = vsel %vm362_vm8, 1, %v1274_v0  ;;  %v610_v57 = vsel %vm363_vm9, 1, %v1274_v0 }
  0x94   : > { %v365_v42 = vpop.permute.xlu0 %364  ;;  %v614_v60 = vrot.slane %v609_v56, %v1365_v10  ;;  %v618_v61 = vrot.slane %v610_v57, %v1365_v10 }
  0x95   : > { %v374_v49 = vpop.permute.xlu1 %373  ;;  %v369_v52 = vsel %vm1900_vm6, %v365_v42, %v367_v43  ;;  %v370_v53 = vsel %vm1900_vm6, %v367_v43, %v365_v42  ;;  %v1935_v42 = vmov 0 }
  0x96   : > { %vm371_vm10 = vcmp.eq.s32.totalorder %v369_v52, %v1371_v12  ;;  %vm372_vm11 = vcmp.eq.s32.totalorder %v370_v53, %v1375_v14  ;;  %vm1492_vm1 = vcmp.eq.s32.totalorder %v614_v60, 1  ;;  %vm1496_vm4 = vcmp.eq.s32.totalorder %v618_v61, 1 }
  0x97   : > { %v631_v62 = vsel %vm371_vm10, 1, %v1274_v0  ;;  %v632_v63 = vsel %vm372_vm11, 1, %v1274_v0  ;;  %v1930_v13 = vsel %vm1492_vm1, 4294967295, %v1929_v13  ;;  %v1939_v52 = vmov 0 }
  0x98   : > { %v376_v48 = vpop.permute.xlu0 %375  ;;  %vm1904_vm11 = vcmp.lt.s32.totalorder %v1442_v41, 32 }
  0x99   : > { %v378_v54 = vsel %vm1901_vm7, %v374_v49, %v376_v48  ;;  %v379_v55 = vsel %vm1901_vm7, %v376_v48, %v374_v49 }
  0x9a   : > { %vm380_vm12 = vcmp.eq.s32.totalorder %v378_v54, %v1371_v12  ;;  %vm381_vm13 = vcmp.eq.s32.totalorder %v379_v55, %v1375_v14 }
  0x9b   : > { %v653_v3 = vsel %vm380_vm12, 1, %v1274_v0  ;;  %v654_v4 = vsel %vm381_vm13, 1, %v1274_v0  ;;  %vm1912_vm12 = vcmp.lt.s32.totalorder %v1442_v41, 16  ;;  %vm1923_vm13 = vcmp.lt.s32.totalorder %v1442_v41, 112 }
  0xd5   : > { %v550_v16 = vpop.f32.mrf.mxu0 }
  0xd6   : > { %v563_v17 = vmul.f32 %v561_v15, %v550_v16  ;;  %v636_v16 = vrot.slane %v631_v62, %v1365_v10 }
  0xd7   : > { %v552_v19 = vpop.f32.mrf.mxu0 }
  0xd8   : > { %v571_v20 = vadd.f32 %v569_v18, %v563_v17  ;;  %v564_v21 = vmul.f32 %v561_v15, %v552_v19  ;;  %v1931_v15 = vmov 0  ;;  %v640_v17 = vrot.slane %v632_v63, %v1365_v10 }
  0xd9   : > { %v554_v22 = vpop.f32.mrf.mxu0  ;;  %v1932_v15 = vsel %vm1496_vm4, 4294967295, %v1931_v15  ;;  %vm1522_vm5 = vcmp.eq.s32.totalorder %v636_v16, 1 }
  0xda   : > { %v573_v23 = vmul.f32 0.5, %v571_v20  ;;  %v572_v24 = vadd.f32 %v569_v18, %v564_v21  ;;  %v658_v22 = vrot.slane %v653_v3, %v1365_v10  ;;  %v1934_v40 = vsel %vm1522_vm5, 4294967295, %v1933_v40 }
  0xdb   : > { %v555_v25 = vpop.f32.mrf.mxu0  ;;  %vm1526_vm8 = vcmp.eq.s32.totalorder %v640_v17, 1 }
  0xdc   : > { %1258 = vtanh.f32 %v573_v23  ;;  %v574_v26 = vmul.f32 0.5, %v572_v24  ;;  %v1936_v42 = vsel %vm1526_vm8, 4294967295, %v1935_v42  ;;  %vm1542_vm9 = vcmp.eq.s32.totalorder %v658_v22, 1 }
  0xdd   : > { %v1938_v51 = vsel %vm1542_vm9, 4294967295, %v1937_v51 }
  0xde   : > { %1260 = vtanh.f32 %v574_v26 }
  0xe9   : > { %v1259_v27 = vpop.eup %1258 }
  0xea   : > { %v577_v28 = vadd.f32 1.0, %v1259_v27 }
  0xeb   : > { %v1261_v29 = vpop.eup %1260 }
  0xec   : > { %v578_v30 = vadd.f32 1.0, %v1261_v29  ;;  %v1391_v31 = vmul.f32 %v577_v28, %v573_v23  ;;  %v662_v23 = vrot.slane %v654_v4, %v1365_v10 }
  0xee   : > { %v1393_v32 = vmul.f32 %v578_v30, %v574_v26  ;;  %vm1546_vm10 = vcmp.eq.s32.totalorder %v662_v23, 1 }
  0xef   : > { %v1940_v52 = vsel %vm1546_vm10, 4294967295, %v1939_v52 }
  0xf0   : > { %v1140_v33 = vpack.i.bf16 %v1393_v32, %v1391_v31 }
  0xf2   : > { %1141 = vrot.lane.b32.xlu1 %v1140_v33, %s1276_s24  ;;  %1136 = vrot.lane.b32.xlu0 %v1140_v33, %s1275_s23 }
  0xf6   : > { %1151 = vrot.lane.b32.xlu1 %v1140_v33, %s1278_s26  ;;  %1146 = vrot.lane.b32.xlu0 %v1140_v33, %s1277_s25 }
  0xfa   : > { %384 = vrot.lane.b32.xlu1 %v1375_v14, %s1279_s27  ;;  %382 = vrot.lane.b32.xlu0 %v1371_v12, %s1279_s27 }
  0xfe   : > { %419 = vrot.lane.b32.xlu1 %v1375_v14, %s1280_s28  ;;  %417 = vrot.lane.b32.xlu0 %v1371_v12, %s1280_s28 }
 0x102   : > { %446 = vrot.lane.b32.xlu1 %v1375_v14, %s1281_s12  ;;  %444 = vrot.lane.b32.xlu0 %v1371_v12, %s1281_s12 }
 0x106   : > { %399 = vrot.lane.b32.xlu1 %v1416_v35, %s1279_s27  ;;  %397 = vrot.lane.b32.xlu0 %v1419_v36, %s1279_s27 }
 0x10a   : > { %473 = vrot.lane.b32.xlu1 %v1375_v14, %s1282_s13  ;;  %471 = vrot.lane.b32.xlu0 %v1371_v12, %s1282_s13 }
 0x10e   : > { %426 = vrot.lane.b32.xlu1 %v1416_v35, %s1280_s28  ;;  %424 = vrot.lane.b32.xlu0 %v1419_v36, %s1280_s28 }
 0x112   : > { %453 = vrot.lane.b32.xlu1 %v1416_v35, %s1281_s12  ;;  %451 = vrot.lane.b32.xlu0 %v1419_v36, %s1281_s12 }
 0x116   : > { %480 = vrot.lane.b32.xlu1 %v1416_v35, %s1282_s13  ;;  %478 = vrot.lane.b32.xlu0 %v1419_v36, %s1282_s13 }
 0x164   : > { %v1142_v5 = vpop.permute.xlu1 %1141  ;;  %v1137_v6 = vpop.permute.xlu0 %1136 }
 0x165   : > { %v1144_v7 = vunpack.i.h.bf16 %v1142_v5  ;;  %v1143_v8 = vunpack.i.l.bf16 %v1142_v5  ;;  %v1139_v9 = vunpack.i.h.bf16 %v1137_v6  ;;  %v1138_v11 = vunpack.i.l.bf16 %v1137_v6 }
 0x167   : > { %v607_v18 = vsel %vm1903_vm3, %v1143_v8, %v1144_v7  ;;  %v608_v19 = vsel %vm1903_vm3, %v1144_v7, %v1143_v8  ;;  %v585_v20 = vsel %vm1902_vm2, %v1138_v11, %v1139_v9  ;;  %v586_v21 = vsel %vm1902_vm2, %v1139_v9, %v1138_v11 }
 0x168   : > { %v599_v24 = vsel %vm1482_vm14, %v586_v21, -inf  ;;  %v600_v25 = vsel %vm1486_vm15, %v585_v20, -inf  ;;  %v1152_v26 = vpop.permute.xlu1 %1151  ;;  %v1147_v27 = vpop.permute.xlu0 %1146  ;;  %v621_v34 = vsel %vm1492_vm1, %v608_v19, -inf  ;;  %v622_v37 = vsel %vm1496_vm4, %v607_v18, -inf }
 0x169   : > { %v601_v28 = vmax.f32 %v1391_v31, %v599_v24  ;;  %v602_v29 = vmax.f32 %v1393_v32, %v600_v25  ;;  %v1154_v30 = vunpack.i.h.bf16 %v1152_v26  ;;  %v1153_v33 = vunpack.i.l.bf16 %v1152_v26 }
 0x16a   : > { %v1149_v38 = vunpack.i.h.bf16 %v1147_v27  ;;  %v1148_v39 = vunpack.i.l.bf16 %v1147_v27 }
 0x16b   : > { %v623_v43 = vmax.f32 %v601_v28, %v621_v34  ;;  %v624_v44 = vmax.f32 %v602_v29, %v622_v37  ;;  %v651_v45 = vsel %vm1901_vm7, %v1153_v33, %v1154_v30  ;;  %v652_v46 = vsel %vm1901_vm7, %v1154_v30, %v1153_v33 }
 0x16c   : > { %v629_v47 = vsel %vm1900_vm6, %v1148_v39, %v1149_v38  ;;  %v630_v48 = vsel %vm1900_vm6, %v1149_v38, %v1148_v39  ;;  %v665_v55 = vsel %vm1542_vm9, %v651_v45, -inf  ;;  %v666_v56 = vsel %vm1546_vm10, %v652_v46, -inf  ;;  %v385_v60 = vpop.permute.xlu1 %384  ;;  %v383_v61 = vpop.permute.xlu0 %382 }
 0x16d   : > { %v643_v49 = vsel %vm1522_vm5, %v629_v47, -inf  ;;  %v644_v50 = vsel %vm1526_vm8, %v630_v48, -inf  ;;  %v388_v7 = vsel %vm1904_vm11, %v385_v60, %v383_v61  ;;  %v387_v11 = vsel %vm1904_vm11, %v383_v61, %v385_v60 }
 0x16e   : > { %v645_v53 = vmax.f32 %v623_v43, %v643_v49  ;;  %v646_v54 = vmax.f32 %v624_v44, %v644_v50  ;;  %v405_v17 = vsub.s32 %v388_v7, %v1371_v12  ;;  %v406_v19 = vsub.s32 %v387_v11, %v1375_v14 }
 0x16f   : > { %vm1941_vm5 = vcmp.lt.s32.totalorder %v1442_v41, 96 }
 0x170   : > { %v1554_v57 = vmax.f32 %v645_v53, %v665_v55  ;;  %v1556_v58 = vmax.f32 %v646_v54, %v666_v56  ;;  %v420_v62 = vpop.permute.xlu1 %419  ;;  %v418_v63 = vpop.permute.xlu0 %417  ;;  %v408_v26 = vsub.s32 0, %v405_v17  ;;  %v411_v28 = vsub.s32 0, %v406_v19  ;;  %vm1942_vm14 = vmmov %vm1941_vm5 }
 0x171   : > { %v423_v16 = vsel %vm1912_vm12, %v420_v62, %v418_v63  ;;  %v422_v18 = vsel %vm1912_vm12, %v418_v63, %v420_v62 }
 0x172   : > { %v1160_v59 = vpack.i.bf16 %v1556_v58, %v1554_v57  ;;  %v432_v20 = vsub.s32 %v423_v16, %v1371_v12  ;;  %v433_v22 = vsub.s32 %v422_v18, %v1375_v14  ;;  %v1098_v39 = vmin.u32 %v408_v26, %v405_v17 }
 0x173   : > { %v1099_v44 = vmin.u32 %v411_v28, %v406_v19 }
 0x174   : > { %1161 = vrot.lane.b32.xlu1 %v1160_v59, %s1280_s28  ;;  %1156 = vrot.lane.b32.xlu0 %v1160_v59, %s1279_s27  ;;  %v447_v3 = vpop.permute.xlu1 %446  ;;  %v445_v4 = vpop.permute.xlu0 %444  ;;  %v435_v33 = vsub.s32 0, %v432_v20  ;;  %v438_v37 = vsub.s32 0, %v433_v22  ;;  %vm413_vm6 = vcmp.le.s32.totalorder %v1098_v39, 2 }
 0x175   : > { %v449_v21 = vsel %vm1923_vm13, %v445_v4, %v447_v3  ;;  %v450_v23 = vsel %vm1923_vm13, %v447_v3, %v445_v4  ;;  %vm414_vm2 = vcmp.le.s32.totalorder %v1099_v44, 2 }
 0x176   : > { %v459_v29 = vsub.s32 %v449_v21, %v1371_v12  ;;  %v460_v34 = vsub.s32 %v450_v23, %v1375_v14  ;;  %v1100_v49 = vmin.u32 %v435_v33, %v432_v20  ;;  %v1101_v54 = vmin.u32 %v438_v37, %v433_v22 }
 0x178   : > { %1171 = vrot.lane.b32.xlu1 %v1160_v59, %s1282_s13  ;;  %1166 = vrot.lane.b32.xlu0 %v1160_v59, %s1281_s12  ;;  %v400_v5 = vpop.permute.xlu1 %399  ;;  %v398_v6 = vpop.permute.xlu0 %397  ;;  %v462_v45 = vsub.s32 0, %v459_v29  ;;  %v465_v50 = vsub.s32 0, %v460_v34  ;;  %vm441_vm9 = vcmp.le.s32.totalorder %v1101_v54, 2 }
 0x179   : > { %v402_v46 = vsel %vm1904_vm11, %v400_v5, %v398_v6  ;;  %v401_v53 = vsel %vm1904_vm11, %v398_v6, %v400_v5  ;;  %vm440_vm11 = vcmp.le.s32.totalorder %v1100_v49, 2 }
 0x17a   : > { %vm403_vm7 = vcmp.eq.s32.totalorder %v402_v46, %v1419_v36  ;;  %v1102_v59 = vmin.u32 %v462_v45, %v459_v29  ;;  %vm404_vm3 = vcmp.eq.s32.totalorder %v401_v53, %v1416_v35  ;;  %v1103_v62 = vmin.u32 %v465_v50, %v460_v34 }
 0x17b   : > { %vm415_vm10 = vmand %vm403_vm7, %vm413_vm6 }
 0x17c   : > { %v474_v8 = vpop.permute.xlu1 %473  ;;  %v472_v9 = vpop.permute.xlu0 %471  ;;  %vm467_vm1 = vcmp.le.s32.totalorder %v1102_v59, 2  ;;  %vm468_vm7 = vcmp.le.s32.totalorder %v1103_v62, 2 }
 0x17d   : > { %v476_v27 = vsel %vm1905_vm0, %v472_v9, %v474_v8  ;;  %v477_v30 = vsel %vm1905_vm0, %v474_v8, %v472_v9  ;;  %v675_v8 = vsel %vm415_vm10, 1, %v1274_v0 }
 0x17e   : > { %v486_v38 = vsub.s32 %v476_v27, %v1371_v12  ;;  %v487_v43 = vsub.s32 %v477_v30, %v1375_v14  ;;  %v680_v17 = vrot.slane %v675_v8, %v1365_v10 }
 0x180   : > { %v427_v24 = vpop.permute.xlu1 %426  ;;  %v425_v25 = vpop.permute.xlu0 %424  ;;  %v489_v55 = vsub.s32 0, %v486_v38  ;;  %v492_v14 = vsub.s32 0, %v487_v43 }
 0x181   : > { %v429_v12 = vsel %vm1912_vm12, %v427_v24, %v425_v25  ;;  %v428_v56 = vsel %vm1912_vm12, %v425_v25, %v427_v24  ;;  %vm416_vm12 = vmand %vm404_vm3, %vm414_vm2 }
 0x182   : > { %vm430_vm0 = vcmp.eq.s32.totalorder %v429_v12, %v1419_v36  ;;  %v1104_v3 = vmin.u32 %v489_v55, %v486_v38  ;;  %vm431_vm8 = vcmp.eq.s32.totalorder %v428_v56, %v1416_v35  ;;  %v1105_v5 = vmin.u32 %v492_v14, %v487_v43 }
 0x183   : > { %vm442_vm4 = vmand %vm430_vm0, %vm440_vm11  ;;  %v676_v9 = vsel %vm416_vm12, 1, %v1274_v0  ;;  %vm1951_vm12 = vcmp.lt.s32.totalorder %v1442_v41, 16 }
 0x184   : > { %v454_v47 = vpop.permute.xlu1 %453  ;;  %v452_v48 = vpop.permute.xlu0 %451  ;;  %vm443_vm6 = vmand %vm431_vm8, %vm441_vm9  ;;  %vm494_vm2 = vcmp.le.s32.totalorder %v1104_v3, 2  ;;  %vm495_vm0 = vcmp.le.s32.totalorder %v1105_v5, 2  ;;  %v697_v11 = vsel %vm442_vm4, 1, %v1274_v0  ;;  %v684_v18 = vrot.slane %v676_v9, %v1365_v10 }
 0x185   : > { %v455_v63 = vsel %vm1923_vm13, %v452_v48, %v454_v47  ;;  %v456_v4 = vsel %vm1923_vm13, %v454_v47, %v452_v48  ;;  %v698_v16 = vsel %vm443_vm6, 1, %v1274_v0  ;;  %v702_v19 = vrot.slane %v697_v11, %v1365_v10 }
 0x186   : > { %vm457_vm15 = vcmp.eq.s32.totalorder %v455_v63, %v1419_v36  ;;  %vm458_vm13 = vcmp.eq.s32.totalorder %v456_v4, %v1416_v35  ;;  %v706_v20 = vrot.slane %v698_v16, %v1365_v10  ;;  %vm1953_vm6 = vcmp.lt.s32.totalorder %v1442_v41, 32 }
 0x187   : > { %vm1636_vm4 = vcmp.eq.s32.totalorder %v702_v19, 1 }
 0x188   : > { %v481_v60 = vpop.permute.xlu1 %480  ;;  %v479_v61 = vpop.permute.xlu0 %478  ;;  %vm1640_vm10 = vcmp.eq.s32.totalorder %v706_v20, 1 }
 0x189   : > { %v482_v6 = vsel %vm1941_vm5, %v479_v61, %v481_v60  ;;  %v483_v7 = vsel %vm1942_vm14, %v481_v60, %v479_v61  ;;  %vm469_vm5 = vmand %vm457_vm15, %vm467_vm1  ;;  %vm1626_vm15 = vcmp.eq.s32.totalorder %v680_v17, 1  ;;  %vm1630_vm1 = vcmp.eq.s32.totalorder %v684_v18, 1 }
 0x18a   : > { %vm484_vm3 = vcmp.eq.s32.totalorder %v482_v6, %v1419_v36  ;;  %vm485_vm11 = vcmp.eq.s32.totalorder %v483_v7, %v1416_v35  ;;  %vm470_vm14 = vmand %vm458_vm13, %vm468_vm7  ;;  %v719_v36 = vsel %vm469_vm5, 1, %v1274_v0  ;;  %vm1959_vm5 = vcmp.lt.s32.totalorder %v1442_v41, 96 }
 0x18b   : > { %vm496_vm8 = vmand %vm484_vm3, %vm494_vm2  ;;  %v720_v21 = vsel %vm470_vm14, 1, %v1274_v0  ;;  %v724_v37 = vrot.slane %v719_v36, %v1365_v10  ;;  %v1963_v7 = vmov 0 }
 0x18c   : > { %vm497_vm9 = vmand %vm485_vm11, %vm495_vm0  ;;  %v741_v23 = vsel %vm496_vm8, 1, %v1274_v0  ;;  %v728_v38 = vrot.slane %v720_v21, %v1365_v10  ;;  %vm1961_vm11 = vcmp.lt.s32.totalorder %v1442_v41, 112 }
 0x18d   : > { %v742_v24 = vsel %vm497_vm9, 1, %v1274_v0  ;;  %vm1952_vm13 = vmmov %vm1951_vm12  ;;  %v746_v45 = vrot.slane %v741_v23, %v1365_v10  ;;  %vm1666_vm2 = vcmp.eq.s32.totalorder %v724_v37, 1 }
 0x18e   : > { %vm1954_vm7 = vmmov %vm1953_vm6  ;;  %v750_v46 = vrot.slane %v742_v24, %v1365_v10  ;;  %vm1670_vm3 = vcmp.eq.s32.totalorder %v728_v38, 1 }
 0x18f   : > { %vm1960_vm0 = vmmov %vm1959_vm5  ;;  %vm1686_vm8 = vcmp.eq.s32.totalorder %v746_v45, 1 }
 0x190   : > { %vm1962_vm14 = vmmov %vm1961_vm11  ;;  %v1964_v7 = vsel %vm1686_vm8, 4294967295, %v1963_v7  ;;  %vm1690_vm9 = vcmp.eq.s32.totalorder %v750_v46, 1 }
 0x1e6   : > { %v1162_v25 = vpop.permute.xlu1 %1161  ;;  %v1157_v26 = vpop.permute.xlu0 %1156 }
 0x1e7   : > { %v1164_v27 = vunpack.i.h.bf16 %v1162_v25  ;;  %v1163_v28 = vunpack.i.l.bf16 %v1162_v25  ;;  %v1159_v29 = vunpack.i.h.bf16 %v1157_v26  ;;  %v1158_v30 = vunpack.i.l.bf16 %v1157_v26 }
 0x1e9   : > { %v695_v0 = vsel %vm1951_vm12, %v1163_v28, %v1164_v27  ;;  %v696_v39 = vsel %vm1952_vm13, %v1164_v27, %v1163_v28  ;;  %v673_v43 = vsel %vm1953_vm6, %v1158_v30, %v1159_v29  ;;  %v674_v44 = vsel %vm1954_vm7, %v1159_v29, %v1158_v30 }
 0x1ea   : > { %v687_v47 = vsel %vm1626_vm15, %v674_v44, -inf  ;;  %v688_v48 = vsel %vm1630_vm1, %v673_v43, -inf  ;;  %v1172_v49 = vpop.permute.xlu1 %1171  ;;  %v1167_v50 = vpop.permute.xlu0 %1166  ;;  %v709_v14 = vsel %vm1636_vm4, %v696_v39, -inf  ;;  %v710_v10 = vsel %vm1640_vm10, %v695_v0, -inf }
 0x1eb   : > { %v689_v53 = vmax.f32 %v1554_v57, %v687_v47  ;;  %v690_v54 = vmax.f32 %v1556_v58, %v688_v48  ;;  %v1174_v55 = vunpack.i.h.bf16 %v1172_v49  ;;  %v1173_v12 = vunpack.i.l.bf16 %v1172_v49 }
 0x1ec   : > { %v1169_v56 = vunpack.i.h.bf16 %v1167_v50  ;;  %v1168_v59 = vunpack.i.l.bf16 %v1167_v50  ;;  %vm1967_vm12 = vcmp.lt.s32.totalorder %v1442_v41, 1  ;;  %vm1969_vm6 = vcmp.lt.s32.totalorder %v1442_v41, 2 }
 0x1ed   : > { %v711_v57 = vmax.f32 %v689_v53, %v709_v14  ;;  %v712_v58 = vmax.f32 %v690_v54, %v710_v10  ;;  %v739_v62 = vsel %vm1959_vm5, %v1173_v12, %v1174_v55  ;;  %v740_v63 = vsel %vm1960_vm0, %v1174_v55, %v1173_v12  ;;  %vm1968_vm13 = vmmov %vm1967_vm12 }
 0x1ee   : > { %v717_v3 = vsel %vm1961_vm11, %v1168_v59, %v1169_v56  ;;  %v718_v4 = vsel %vm1962_vm14, %v1169_v56, %v1168_v59  ;;  %v753_v16 = vsel %vm1686_vm8, %v739_v62, -inf  ;;  %v754_v17 = vsel %vm1690_vm9, %v740_v63, -inf  ;;  %vm1970_vm7 = vmmov %vm1969_vm6 }
 0x1ef   : > { %v731_v5 = vsel %vm1666_vm2, %v717_v3, -inf  ;;  %v732_v6 = vsel %vm1670_vm3, %v718_v4, -inf  ;;  %vm1971_vm5 = vnez %v1926_v1  ;;  %vm1972_vm0 = vnez %v1928_v2 }
 0x1f0   : > { %v733_v9 = vmax.f32 %v711_v57, %v731_v5  ;;  %v734_v11 = vmax.f32 %v712_v58, %v732_v6  ;;  %vm1973_vm11 = vnez %v1930_v13  ;;  %vm1974_vm14 = vnez %v1932_v15 }
 0x1f2   : > { %v1698_v18 = vmax.f32 %v733_v9, %v753_v16  ;;  %v1700_v19 = vmax.f32 %v734_v11, %v754_v17 }
 0x1f4   : > { %v1180_v20 = vpack.i.bf16 %v1700_v19, %v1698_v18  ;;  %v921_v35 = vpack.c.bf16 %v1700_v19, %v1700_v19 }
 0x1f6   : > { %1181 = vrot.lane.b32.xlu1 %v1180_v20, %s1276_s24  ;;  %1176 = vrot.lane.b32.xlu0 %v1180_v20, %s1275_s23  ;;  %v929_v60 = vrot.slane %v921_v35, 6 }
 0x1fa   : > { %1191 = vrot.lane.b32.xlu1 %v1180_v20, %s1278_s26  ;;  %1186 = vrot.lane.b32.xlu0 %v1180_v20, %s1277_s25 }
 0x268   : > { %v1182_v36 = vpop.permute.xlu1 %1181  ;;  %v1177_v21 = vpop.permute.xlu0 %1176 }
 0x269   : > { %v1184_v23 = vunpack.i.h.bf16 %v1182_v36  ;;  %v1183_v24 = vunpack.i.l.bf16 %v1182_v36  ;;  %v1179_v25 = vunpack.i.h.bf16 %v1177_v21  ;;  %v1178_v26 = vunpack.i.l.bf16 %v1177_v21 }
 0x26b   : > { %v771_v27 = vsel %vm1967_vm12, %v1183_v24, %v1184_v23  ;;  %v772_v28 = vsel %vm1968_vm13, %v1184_v23, %v1183_v24  ;;  %v761_v29 = vsel %vm1969_vm6, %v1178_v26, %v1179_v25  ;;  %v762_v30 = vsel %vm1970_vm7, %v1179_v25, %v1178_v26 }
 0x26c   : > { %v763_v37 = vsel %vm1971_vm5, %v762_v30, -inf  ;;  %v764_v38 = vsel %vm1972_vm0, %v761_v29, -inf  ;;  %v1192_v0 = vpop.permute.xlu1 %1191  ;;  %v1187_v39 = vpop.permute.xlu0 %1186  ;;  %v773_v47 = vsel %vm1973_vm11, %v772_v28, -inf  ;;  %v774_v48 = vsel %vm1974_vm14, %v771_v27, -inf }
 0x26d   : > { %v765_v43 = vmax.f32 %v1698_v18, %v763_v37  ;;  %v766_v44 = vmax.f32 %v1700_v19, %v764_v38  ;;  %v1194_v45 = vunpack.i.h.bf16 %v1192_v0  ;;  %v1193_v46 = vunpack.i.l.bf16 %v1192_v0 }
 0x26e   : > { %v1189_v49 = vunpack.i.h.bf16 %v1187_v39  ;;  %v1188_v50 = vunpack.i.l.bf16 %v1187_v39  ;;  %vm1975_vm12 = vcmp.lt.s32.totalorder %v1442_v41, 126  ;;  %vm1977_vm6 = vcmp.lt.s32.totalorder %v1442_v41, 127 }
 0x26f   : > { %v775_v53 = vmax.f32 %v765_v43, %v773_v47  ;;  %v776_v54 = vmax.f32 %v766_v44, %v774_v48  ;;  %v791_v55 = vsel %vm1975_vm12, %v1193_v46, %v1194_v45  ;;  %vm1976_vm13 = vmmov %vm1975_vm12  ;;  %vm1979_vm11 = vnez %v1934_v40  ;;  %v1001_v40 = vld [vmem:[%s1894_s5] sm:$0xff] }
 0x270   : > { %v792_v12 = vsel %vm1976_vm13, %v1194_v45, %v1193_v46  ;;  %v781_v14 = vsel %vm1977_vm6, %v1188_v50, %v1189_v49  ;;  %vm1978_vm7 = vmmov %vm1977_vm6  ;;  %vm1980_vm14 = vnez %v1936_v42  ;;  %vm1981_vm0 = vnez %v1938_v51  ;;  %v1009_v42 = vld [vmem:[%s1895_s6] sm:$0xff] }
 0x271   : > { %v782_v10 = vsel %vm1978_vm7, %v1189_v49, %v1188_v50  ;;  %v783_v56 = vsel %vm1979_vm11, %v781_v14, -inf  ;;  %v793_v62 = vsel %vm1981_vm0, %v791_v55, -inf  ;;  %vm1982_vm12 = vnez %v1940_v52 }
 0x272   : > { %v784_v59 = vsel %vm1980_vm14, %v782_v10, -inf  ;;  %v785_v57 = vmax.f32 %v775_v53, %v783_v56  ;;  %v794_v63 = vsel %vm1982_vm12, %v792_v12, -inf  ;;  %vm1983_vm13 = vcmp.lt.s32.totalorder %v1442_v41, 16 }
 0x273   : > { %v786_v58 = vmax.f32 %v776_v54, %v784_v59  ;;  %vm1984_vm6 = vmmov %vm1983_vm13  ;;  %vm1985_vm7 = vcmp.lt.s32.totalorder %v1442_v41, 32 }
 0x274   : > { %v795_v3 = vmax.f32 %v785_v57, %v793_v62  ;;  %vm1986_vm12 = vmmov %vm1985_vm7 }
 0x275   : > { %v796_v4 = vmax.f32 %v786_v58, %v794_v63 }
 0x277   : > { %v1200_v5 = vpack.i.bf16 %v796_v4, %v795_v3 }
 0x279   : > { %1201 = vrot.lane.b32.xlu1 %v1200_v5, %s1280_s28  ;;  %1196 = vrot.lane.b32.xlu0 %v1200_v5, %s1279_s27 }
 0x27d   : > { %1211 = vrot.lane.b32.xlu1 %v1200_v5, %s1282_s13  ;;  %1206 = vrot.lane.b32.xlu0 %v1200_v5, %s1281_s12 }
 0x2eb   : > { %v1202_v6 = vpop.permute.xlu1 %1201  ;;  %v1197_v9 = vpop.permute.xlu0 %1196 }
 0x2ec   : > { %v1204_v11 = vunpack.i.h.bf16 %v1202_v6  ;;  %v1203_v16 = vunpack.i.l.bf16 %v1202_v6  ;;  %v1199_v17 = vunpack.i.h.bf16 %v1197_v9  ;;  %v1198_v20 = vunpack.i.l.bf16 %v1197_v9 }
 0x2ee   : > { %v811_v36 = vsel %vm1983_vm13, %v1203_v16, %v1204_v11  ;;  %v812_v21 = vsel %vm1984_vm6, %v1204_v11, %v1203_v16  ;;  %v801_v23 = vsel %vm1985_vm7, %v1198_v20, %v1199_v17  ;;  %v802_v24 = vsel %vm1986_vm12, %v1199_v17, %v1198_v20 }
 0x2ef   : > { %v803_v25 = vsel %vm1626_vm15, %v802_v24, -inf  ;;  %v804_v26 = vsel %vm1630_vm1, %v801_v23, -inf  ;;  %v1212_v27 = vpop.permute.xlu1 %1211  ;;  %v1207_v28 = vpop.permute.xlu0 %1206  ;;  %v813_v0 = vsel %vm1636_vm4, %v812_v21, -inf  ;;  %v814_v39 = vsel %vm1640_vm10, %v811_v36, -inf }
 0x2f0   : > { %v805_v29 = vmax.f32 %v795_v3, %v803_v25  ;;  %v806_v30 = vmax.f32 %v796_v4, %v804_v26  ;;  %v1214_v37 = vunpack.i.h.bf16 %v1212_v27  ;;  %v1213_v38 = vunpack.i.l.bf16 %v1212_v27 }
 0x2f1   : > { %v1209_v43 = vunpack.i.h.bf16 %v1207_v28  ;;  %v1208_v44 = vunpack.i.l.bf16 %v1207_v28  ;;  %vm1987_vm12 = vcmp.lt.s32.totalorder %v1442_v41, 96  ;;  %vm1989_vm6 = vcmp.lt.s32.totalorder %v1442_v41, 112 }
 0x2f2   : > { %v815_v45 = vmax.f32 %v805_v29, %v813_v0  ;;  %v816_v46 = vmax.f32 %v806_v30, %v814_v39  ;;  %v831_v47 = vsel %vm1987_vm12, %v1213_v38, %v1214_v37  ;;  %vm1988_vm13 = vmmov %vm1987_vm12  ;;  %vm1991_vm12 = vcmp.lt.s32.totalorder %v1442_v41, 1 }
 0x2f3   : > { %v832_v48 = vsel %vm1988_vm13, %v1214_v37, %v1213_v38  ;;  %v821_v49 = vsel %vm1989_vm6, %v1208_v44, %v1209_v43  ;;  %vm1990_vm7 = vmmov %vm1989_vm6  ;;  %v833_v14 = vsel %vm1686_vm8, %v831_v47, -inf  ;;  %vm1993_vm6 = vcmp.lt.s32.totalorder %v1442_v41, 2 }
 0x2f4   : > { %v822_v50 = vsel %vm1990_vm7, %v1209_v43, %v1208_v44  ;;  %v823_v53 = vsel %vm1666_vm2, %v821_v49, -inf  ;;  %v834_v10 = vsel %vm1690_vm9, %v832_v48, -inf  ;;  %vm1992_vm13 = vmmov %vm1991_vm12  ;;  %vm1995_vm8 = vnez %v1928_v2 }
 0x2f5   : > { %v824_v54 = vsel %vm1670_vm3, %v822_v50, -inf  ;;  %v825_v55 = vmax.f32 %v815_v45, %v823_v53  ;;  %vm1994_vm7 = vmmov %vm1993_vm6 }
 0x2f6   : > { %v826_v12 = vmax.f32 %v816_v46, %v824_v54 }
 0x2f7   : > { %v1778_v56 = vmax.f32 %v825_v55, %v833_v14 }
 0x2f8   : > { %v1780_v59 = vmax.f32 %v826_v12, %v834_v10 }
 0x2fa   : > { %v1220_v57 = vpack.i.bf16 %v1780_v59, %v1778_v56 }
 0x2fc   : > { %1221 = vrot.lane.b32.xlu1 %v1220_v57, %s1276_s24  ;;  %1216 = vrot.lane.b32.xlu0 %v1220_v57, %s1275_s23  ;;  %s332_s23 = scalar_lea.vmem %s1898_s9, %s1114_s15 }
 0x300   : > { %1231 = vrot.lane.b32.xlu1 %v1220_v57, %s1278_s26  ;;  %1226 = vrot.lane.b32.xlu0 %v1220_v57, %s1277_s25 }
 0x36e   : > { %v1222_v58 = vpop.permute.xlu1 %1221  ;;  %v1217_v62 = vpop.permute.xlu0 %1216 }
 0x36f   : > { %v1224_v63 = vunpack.i.h.bf16 %v1222_v58  ;;  %v1223_v3 = vunpack.i.l.bf16 %v1222_v58  ;;  %v1219_v4 = vunpack.i.h.bf16 %v1217_v62  ;;  %v1218_v5 = vunpack.i.l.bf16 %v1217_v62 }
 0x371   : > { %v851_v6 = vsel %vm1991_vm12, %v1223_v3, %v1224_v63  ;;  %v852_v9 = vsel %vm1992_vm13, %v1224_v63, %v1223_v3  ;;  %v841_v11 = vsel %vm1993_vm6, %v1218_v5, %v1219_v4  ;;  %v842_v16 = vsel %vm1994_vm7, %v1219_v4, %v1218_v5 }
 0x372   : > { %v843_v17 = vsel %vm1971_vm5, %v842_v16, -inf  ;;  %v844_v20 = vsel %vm1995_vm8, %v841_v11, -inf  ;;  %v1232_v36 = vpop.permute.xlu1 %1231  ;;  %v1227_v21 = vpop.permute.xlu0 %1226  ;;  %vm1996_vm12 = vnez %v1930_v13  ;;  %vm1997_vm13 = vnez %v1932_v15 }
 0x373   : > { %v845_v23 = vmax.f32 %v1778_v56, %v843_v17  ;;  %v846_v24 = vmax.f32 %v1780_v59, %v844_v20  ;;  %v1234_v25 = vunpack.i.h.bf16 %v1232_v36  ;;  %v1233_v26 = vunpack.i.l.bf16 %v1232_v36 }
 0x374   : > { %v853_v27 = vsel %vm1996_vm12, %v852_v9, -inf  ;;  %v854_v28 = vsel %vm1997_vm13, %v851_v6, -inf  ;;  %v1229_v29 = vunpack.i.h.bf16 %v1227_v21  ;;  %v1228_v1 = vunpack.i.l.bf16 %v1227_v21 }
 0x375   : > { %v855_v30 = vmax.f32 %v845_v23, %v853_v27  ;;  %v856_v37 = vmax.f32 %v846_v24, %v854_v28  ;;  %vm1998_vm8 = vcmp.lt.s32.totalorder %v1442_v41, 126  ;;  %vm2000_vm6 = vcmp.lt.s32.totalorder %v1442_v41, 127 }
 0x376   : > { %v871_v2 = vsel %vm1998_vm8, %v1233_v26, %v1234_v25  ;;  %vm1999_vm5 = vmmov %vm1998_vm8  ;;  %v861_v0 = vsel %vm2000_vm6, %v1228_v1, %v1229_v29  ;;  %vm2002_vm12 = vnez %v1940_v52  ;;  %v920_v21 = vpack.c.bf16 %v1698_v18, %v1698_v18 }
 0x377   : > { %v872_v38 = vsel %vm1999_vm5, %v1234_v25, %v1233_v26  ;;  %vm2001_vm7 = vmmov %vm2000_vm6  ;;  %v863_v15 = vsel %vm1979_vm11, %v861_v0, -inf  ;;  %v873_v45 = vsel %vm1981_vm0, %v871_v2, -inf  ;;  %vm2003_vm0 = vcmp.lt.s32.totalorder %v1442_v41, 16 }
 0x378   : > { %v862_v13 = vsel %vm2001_vm7, %v1229_v29, %v1228_v1  ;;  %v865_v43 = vmax.f32 %v855_v30, %v863_v15  ;;  %v874_v46 = vsel %vm2002_vm12, %v872_v38, -inf  ;;  %vm2004_vm11 = vmmov %vm2003_vm0  ;;  %v923_v18 = vpack.c.bf16 %v1780_v59, %v1780_v59 }
 0x379   : > { %v864_v39 = vsel %vm1980_vm14, %v862_v13, -inf  ;;  %vm2005_vm14 = vcmp.lt.s32.totalorder %v1442_v41, 32  ;;  %v922_v26 = vpack.c.bf16 %v1778_v56, %v1778_v56  ;;  %vm2011_vm8 = vnez %v1964_v7 }
 0x37a   : > { %v866_v44 = vmax.f32 %v856_v37, %v864_v39  ;;  %v875_v47 = vmax.f32 %v865_v43, %v873_v45  ;;  %vm2006_vm13 = vmmov %vm2005_vm14  ;;  %v928_v37 = vrot.slane %v920_v21, 6  ;;  %v933_v61 = vrot.slane %v923_v18, 4 }
 0x37b   : > { %v932_v2 = vrot.slane %v922_v26, 4  ;;  %v919_v59 = vpack.c.bf16 %v1393_v32, %v1393_v32  ;;  %v918_v56 = vpack.c.bf16 %v1391_v31, %v1391_v31  ;;  %v917_v32 = vld [vmem:[%s1893_s4] sm:$0xf]  ;;  %vm956_vm6 = vcmask 130048  }
 0x37c   : > { %v876_v48 = vmax.f32 %v866_v44, %v874_v46 }
 0x37e   : > { %v1240_v49 = vpack.i.bf16 %v876_v48, %v875_v47 }
 0x380   : > { %1241 = vrot.lane.b32.xlu1 %v1240_v49, %s1280_s28  ;;  %1236 = vrot.lane.b32.xlu0 %v1240_v49, %s1279_s27 }
 0x384   : > { %1251 = vrot.lane.b32.xlu1 %v1240_v49, %s1282_s13  ;;  %1246 = vrot.lane.b32.xlu0 %v1240_v49, %s1281_s12 }
 0x388   : > { %1004 = vperm.xlu0 %1134, %v1001_v40   ;;  %1012 = vperm.xlu1 %1255, %v1009_v42  }
 0x3f2   : > { %v1242_v51 = vpop.permute.xlu1 %1241  ;;  %v1237_v52 = vpop.permute.xlu0 %1236 }
 0x3f3   : > { %v1244_v50 = vunpack.i.h.bf16 %v1242_v51  ;;  %v1243_v53 = vunpack.i.l.bf16 %v1242_v51  ;;  %v1239_v54 = vunpack.i.h.bf16 %v1237_v52  ;;  %v1238_v55 = vunpack.i.l.bf16 %v1237_v52 }
 0x3f5   : > { %v891_v12 = vsel %vm2003_vm0, %v1243_v53, %v1244_v50  ;;  %v892_v14 = vsel %vm2004_vm11, %v1244_v50, %v1243_v53  ;;  %v881_v10 = vsel %vm2005_vm14, %v1238_v55, %v1239_v54  ;;  %v882_v57 = vsel %vm2006_vm13, %v1239_v54, %v1238_v55 }
 0x3f6   : > { %v883_v58 = vsel %vm1626_vm15, %v882_v57, -inf  ;;  %v884_v62 = vsel %vm1630_vm1, %v881_v10, -inf  ;;  %v1252_v63 = vpop.permute.xlu1 %1251  ;;  %v1247_v3 = vpop.permute.xlu0 %1246  ;;  %v893_v11 = vsel %vm1636_vm4, %v892_v14, -inf  ;;  %v894_v16 = vsel %vm1640_vm10, %v891_v12, -inf }
 0x3f7   : > { %v885_v4 = vmax.f32 %v875_v47, %v883_v58  ;;  %v886_v5 = vmax.f32 %v876_v48, %v884_v62  ;;  %v1254_v6 = vunpack.i.h.bf16 %v1252_v63  ;;  %v1253_v9 = vunpack.i.l.bf16 %v1252_v63 }
 0x3f8   : > { %v1249_v17 = vunpack.i.h.bf16 %v1247_v3  ;;  %v1248_v20 = vunpack.i.l.bf16 %v1247_v3  ;;  %vm2007_vm15 = vcmp.lt.s32.totalorder %v1442_v41, 96  ;;  %vm2009_vm4 = vcmp.lt.s32.totalorder %v1442_v41, 112 }
 0x3f9   : > { %v896_v36 = vmax.f32 %v886_v5, %v894_v16  ;;  %v895_v22 = vmax.f32 %v885_v4, %v893_v11  ;;  %v911_v23 = vsel %vm2007_vm15, %v1253_v9, %v1254_v6  ;;  %vm2008_vm1 = vmmov %vm2007_vm15 }
 0x3fa   : > { %v912_v33 = vsel %vm2008_vm1, %v1254_v6, %v1253_v9  ;;  %v901_v34 = vsel %vm2009_vm4, %v1248_v20, %v1249_v17  ;;  %vm2010_vm10 = vmmov %vm2009_vm4  ;;  %v913_v41 = vsel %vm2011_vm8, %v911_v23, -inf }
 0x3fb   : > { %v902_v24 = vsel %vm2010_vm10, %v1249_v17, %v1248_v20  ;;  %v903_v25 = vsel %vm1666_vm2, %v901_v34, -inf  ;;  %v914_v29 = vsel %vm1690_vm9, %v912_v33, -inf  ;;  %vm938_vm2 = vcmask 1041408  }
 0x3fc   : > { %v904_v19 = vsel %vm1670_vm3, %v902_v24, -inf  ;;  %v905_v28 = vmax.f32 %v895_v22, %v903_v25  ;;  %vm949_vm3 = vcmask 1045504   ;;  %v944_v13 = vsel %vm938_vm2, %v919_v59, %v929_v60 }
 0x3fd   : > { %v906_v27 = vmax.f32 %v896_v36, %v904_v19  ;;  %v941_v15 = vsel %vm938_vm2, %v918_v56, %v928_v37  ;;  %vm2012_vm9 = vcmask 1043456  }
 0x3fe   : > { %v915_v30 = vmax.f32 %v905_v28, %v913_v41  ;;  %v948_v39 = vsel %vm2012_vm9, %v944_v13, %v933_v61  ;;  %vm2013_vm5 = vmmov %vm2012_vm9 }
 0x3ff   : > { %v916_v1 = vmax.f32 %v906_v27, %v914_v29  ;;  %v946_v43 = vsel %vm2013_vm5, %v941_v15, %v932_v2 }
 0x400   : > { %v924_v0 = vpack.c.bf16 %v915_v30, %v915_v30 }
 0x401   : > { %v925_v38 = vpack.c.bf16 %v916_v1, %v916_v1 }
 0x402   : > { %v936_v7 = vrot.slane %v924_v0, 2 }
 0x403   : > { %v937_v8 = vrot.slane %v925_v38, 2  ;;  %v1005_v31 = vpop.permute.xlu0 %1004  ;;  %v1013_v47 = vpop.permute.xlu1 %1012 }
 0x404   : > { %v951_v45 = vsel %vm949_vm3, %v946_v43, %v936_v7 }
 0x405   : > { %v954_v44 = vsel %vm949_vm3, %v948_v39, %v937_v8 }
 0x406   : > { %974 = vmatprep.subr.bf16.mxu1 %v954_v44 }
 0x407   : > { %975 = vmatpush1.bf16.msra.mxu1 %v951_v45 }
 0x40a   : > { %1110 = vmatmul.mubr.msk.bf16.vlgmr.msra.gmra.mxu1 %vm956_vm6, %v917_v32 }
 0x4ca   : > { %v994_v46 = vpop.f32.mrf.mxu1 }
 0x4cb   : > { %v1007_v48 = vmul.f32 %v1005_v31, %v994_v46 }
 0x4cc   : > { %v996_v49 = vpop.f32.mrf.mxu1 }
 0x4cd   : > { %v1015_v40 = vadd.f32 %v1013_v47, %v1007_v48  ;;  %v1008_v42 = vmul.f32 %v1005_v31, %v996_v49 }
 0x4ce   : > { %v998_v51 = vpop.f32.mrf.mxu1 }
 0x4cf   : > { %v1017_v52 = vmul.f32 0.5, %v1015_v40  ;;  %v1016_v50 = vadd.f32 %v1013_v47, %v1008_v42 }
 0x4d0   : > { %v999_v53 = vpop.f32.mrf.mxu1 }
 0x4d1   : > { %1262 = vtanh.f32 %v1017_v52  ;;  %v1018_v54 = vmul.f32 0.5, %v1016_v50 }
 0x4d3   : > { %1264 = vtanh.f32 %v1018_v54 }
 0x4de   : > { %v1263_v55 = vpop.eup %1262 }
 0x4df   : > { %v1021_v12 = vadd.f32 1.0, %v1263_v55 }
 0x4e0   : > { %v1265_v14 = vpop.eup %1264 }
 0x4e1   : > { %v1022_v10 = vadd.f32 1.0, %v1265_v14  ;;  %v1023_v57 = vmul.f32 %v1021_v12, %v1017_v52 }
 0x4e3   : > { %v1024_v58 = vmul.f32 %v1022_v10, %v1018_v54 }
 0x4e5   : > { %v1116_v62 = vpack.c.bf16 %v1024_v58, %v1023_v57 }
 0x4e7   : > { %1033 = vst [vmem:[%s332_s23] sm:$0xff] %v1116_v62 }
 0x4e8 PF: > { %s19_s30 = sadd.s32 1, %s1272_s30  }
 0x4e9   : > { %p16_p4 = scmp.ge.s32.totalorder %s19_s30, 4  }
 0x4eb   :  { %18 = sbr.rel (!%p16_p4) target bundleno = 1 (0x1), region = 86 }

</bundles_post_ra>
